<compile_context>
chip_gen: v7x
topology: tpu7x:2x2x1
jax: 0.10.0
libtpu: 0.0.40
codegen_flags: <defaults>
</compile_context>

<pallas_src>
import functools

import jax
import jax.numpy as jnp
from jax.experimental import pallas as pl
from jax.experimental.pallas import tpu as pltpu

_D = 128          # padded feature dimension (lane width); all layer dims <= 128
_TILE_B = 128     # batch tile (MXU row dimension; safe on v5e/v6e/v7x)
_ACTS = ("relu", "sig", "relu", "sig", "relu", "sig", "sig")  # per-layer activation


def _mlp_body(x_f32, w_ref, b_ref):
    """Shared fused forward: x (TILE_B, D) f32 -> (TILE_B, D) f32 (col 0 = y_pred)."""
    h = x_f32
    for l, act in enumerate(_ACTS):
        w = w_ref[l]                      # (D, D) bf16, static index -> VMEM load
        b = b_ref[pl.ds(l, 1), :]         # (1, D) f32, static slice
        h = jnp.dot(h.astype(jnp.bfloat16), w,
                    preferred_element_type=jnp.float32) + b
        if act == "relu":
            h = jnp.maximum(h, 0.0)
        else:
            h = jax.nn.sigmoid(h)         # EUP slot, effectively free
    return h


def _mlp_pred_kernel(x_ref, w_ref, b_ref, o_ref):
    o_ref[...] = _mlp_body(x_ref[...], w_ref, b_ref)


def _mlp_loss_kernel(x_ref, w_ref, b_ref, y_ref, loss_ref, *, batch, tile_b):
    i = pl.program_id(0)
    h = _mlp_body(x_ref[...], w_ref, b_ref)
    pred = h[:, 0:1]                                              # (TILE_B, 1)
    rows = jax.lax.broadcasted_iota(jnp.int32, (tile_b, 1), 0) + i * tile_b
    diff = jnp.where(rows < batch, pred - y_ref[...], 0.0)        # mask padded rows
    sse = jnp.sum(diff * diff, keepdims=True)                     # (1, 1)

    @pl.when(i == 0)
    def _():
        loss_ref[...] = jnp.zeros_like(loss_ref)

    loss_ref[...] += sse


def pack_params(params, d=_D):
    """Pack [(W_l (in,out), b_l (1,out))] into one bf16 weight slab + one f32 bias slab."""
    n = len(params)
    w_slab = jnp.zeros((n, d, d), jnp.bfloat16)
    b_rows = ((n + 7) // 8) * 8
    b_slab = jnp.zeros((b_rows, d), jnp.float32)
    for l, (w, b) in enumerate(params):
        fi, fo = w.shape
        w_slab = w_slab.at[l, :fi, :fo].set(w.astype(jnp.bfloat16))
        b_slab = b_slab.at[l, :fo].set(b.reshape(-1).astype(jnp.float32))
    return w_slab, b_slab


def torch_model_forward(x, params, y=None, *, tile_b=_TILE_B):
    """Pallas implementation of TorchModel.forward.

    params: list of (W, b) with W shaped (in, out), b shaped (1, out).
    Returns y_pred of shape (B, 1), or scalar MSE loss if y is given.
    """
    B, in_features = x.shape
    max_dim = max([in_features] + [w.shape[1] for (w, _) in params])
    d = ((max_dim + 127) // 128) * 128
    assert d == _D, "demo assumes all layer widths <= 128"

    b_pad = ((B + tile_b - 1) // tile_b) * tile_b
    n_tiles = b_pad // tile_b

    x_p = jnp.zeros((b_pad, d), jnp.float32).at[:B, :in_features].set(
        x.astype(jnp.float32))
    w_slab, b_slab = pack_params(params, d)

    x_spec = pl.BlockSpec((tile_b, d), lambda i: (i, 0))
    w_spec = pl.BlockSpec(w_slab.shape, lambda i: (0, 0, 0))   # VMEM-resident
    b_spec = pl.BlockSpec(b_slab.shape, lambda i: (0, 0))      # VMEM-resident

    if y is None:
        out = pl.pallas_call(
            _mlp_pred_kernel,
            out_shape=jax.ShapeDtypeStruct((b_pad, d), jnp.float32),
            grid=(n_tiles,),
            in_specs=[x_spec, w_spec, b_spec],
            out_specs=pl.BlockSpec((tile_b, d), lambda i: (i, 0)),  # lane-dense
            compiler_params=pltpu.CompilerParams(
                dimension_semantics=("parallel",)),
        )(x_p, w_slab, b_slab)
        return out[:B, :1]

    # Fused MSE-loss path: scalar accumulator output, masked for batch padding.
    y_p = jnp.zeros((b_pad, 1), jnp.float32).at[:B, :].set(y.astype(jnp.float32))
    kernel = functools.partial(_mlp_loss_kernel, batch=B, tile_b=tile_b)
    sse = pl.pallas_call(
        kernel,
        out_shape=jax.ShapeDtypeStruct((1, 1), jnp.float32),
        grid=(n_tiles,),
        in_specs=[x_spec, w_spec, b_spec,
                  pl.BlockSpec((tile_b, 1), lambda i: (i, 0))],
        out_specs=pl.BlockSpec((1, 1), lambda i: (0, 0)),
        compiler_params=pltpu.CompilerParams(
            dimension_semantics=("arbitrary",)),   # reduction axis -> not parallel
    )(x_p, w_slab, b_slab, y_p)
    return sse[0, 0] / B


def init_params(key, input_size, h1, h2, h3):
    """Deterministic init mimicking nn.Linear (uniform(-1/sqrt(fan_in), +...))."""
    dims = [(input_size, h1), (h1, h1), (h1, h2), (h2, h2), (h2, h3), (h3, h3), (h3, 1)]
    params = []
    for (fan_in, fan_out) in dims:
        key, kw, kb = jax.random.split(key, 3)
        bound = 1.0 / jnp.sqrt(fan_in)
        w = jax.random.uniform(kw, (fan_in, fan_out), jnp.float32, -bound, bound)
        b = jax.random.uniform(kb, (1, fan_out), jnp.float32, -bound, bound)
        params.append((w, b))
    return params


def _reference_forward(x, params):
    """Pure-JAX reference matching the kernel math (bf16 MXU operands, f32 accum)."""
    h = x.astype(jnp.float32)
    for (w, b), act in zip(params, _ACTS):
        h = jnp.dot(h.astype(jnp.bfloat16), w.astype(jnp.bfloat16),
                    preferred_element_type=jnp.float32) + b
        h = jnp.maximum(h, 0.0) if act == "relu" else jax.nn.sigmoid(h)
    return h


if __name__ == "__main__":
    key = jax.random.PRNGKey(0)
    input_size, h1, h2, h3 = 32, 64, 32, 16
    batch = 8

    kp, kx, ky = jax.random.split(key, 3)
    params = init_params(kp, input_size, h1, h2, h3)
    x = jax.random.normal(kx, (batch, input_size), jnp.float32)
    y = jax.random.uniform(ky, (batch, 1), jnp.float32)

    y_pred = torch_model_forward(x, params)
    y_pred = jax.block_until_ready(y_pred)

    loss = torch_model_forward(x, params, y)
    loss = jax.block_until_ready(loss)

    # correctness checks against pure-JAX reference
    ref = _reference_forward(x, params)
    ref_loss = jnp.mean((ref - y) ** 2)
    assert y_pred.shape == (batch, 1)
    assert jnp.allclose(y_pred, ref, atol=1e-4, rtol=1e-4), "y_pred mismatch vs reference"
    assert jnp.allclose(loss, ref_loss, atol=1e-4, rtol=1e-4), "loss mismatch vs reference"

    print("KERNEL_OK")
</pallas_src>

<mosaic_0001>
module attributes {stable_mosaic.version = 11 : i64} {
  func.func @_mlp_pred_kernel(%arg0: i32, %arg1: memref<128x128xf32, #tpu.memory_space<vmem>>, %arg2: memref<7x128x128xbf16, #tpu.memory_space<vmem>>, %arg3: memref<8x128xf32, #tpu.memory_space<vmem>>, %arg4: memref<128x128xf32, #tpu.memory_space<vmem>>) attributes {dimension_semantics = [#tpu.dimension_semantics<parallel>], iteration_bounds = array<i64: 1>, scalar_prefetch = 0 : i64, scratch_operands = 0 : i64, tpu.core_type = #tpu.core_type<tc>, window_params = [{transform_indices = @transform_0, window_bounds = array<i64: 128, 128>}, {pipeline_mode = #tpu.pipeline_mode<synchronous>, transform_indices = @transform_1, window_bounds = array<i64: 7, 128, 128>}, {pipeline_mode = #tpu.pipeline_mode<synchronous>, transform_indices = @transform_2, window_bounds = array<i64: 8, 128>}, {transform_indices = @transform_3, window_bounds = array<i64: 128, 128>}]} {
    %c0 = arith.constant 0 : index
    %c0_0 = arith.constant 0 : index
    %0 = vector.load %arg1[%c0, %c0_0] : memref<128x128xf32, #tpu.memory_space<vmem>>, vector<128x128xf32>
    %c0_1 = arith.constant 0 : index
    %c0_2 = arith.constant 0 : index
    %c0_3 = arith.constant 0 : index
    %1 = vector.load %arg2[%c0_1, %c0_2, %c0_3] : memref<7x128x128xbf16, #tpu.memory_space<vmem>>, vector<1x128x128xbf16>
    %2 = vector.shape_cast %1 : vector<1x128x128xbf16> to vector<128x128xbf16>
    %c0_4 = arith.constant 0 : index
    %c0_5 = arith.constant 0 : index
    %3 = vector.load %arg3[%c0_4, %c0_5] : memref<8x128xf32, #tpu.memory_space<vmem>>, vector<1x128xf32>
    %4 = arith.truncf %0 : vector<128x128xf32> to vector<128x128xbf16>
    %cst = arith.constant dense<0.000000e+00> : vector<128x128xf32>
    %5 = tpu.matmul %4, %2, %cst {dimension_numbers = #tpu.dot_dimension_numbers<[1], [0], [0], [1], [0, 0, 1, 1], [], []>} : vector<128x128xbf16>, vector<128x128xbf16>, vector<128x128xf32> -> vector<128x128xf32>
    %6 = vector.broadcast %3 : vector<1x128xf32> to vector<128x128xf32>
    %7 = arith.addf %5, %6 : vector<128x128xf32>
    %cst_6 = arith.constant 0.000000e+00 : f32
    %8 = vector.broadcast %cst_6 : f32 to vector<128x128xf32>
    %9 = arith.maximumf %7, %8 : vector<128x128xf32>
    %c1 = arith.constant 1 : index
    %c0_7 = arith.constant 0 : index
    %c0_8 = arith.constant 0 : index
    %10 = vector.load %arg2[%c1, %c0_7, %c0_8] : memref<7x128x128xbf16, #tpu.memory_space<vmem>>, vector<1x128x128xbf16>
    %11 = vector.shape_cast %10 : vector<1x128x128xbf16> to vector<128x128xbf16>
    %c1_9 = arith.constant 1 : index
    %c0_10 = arith.constant 0 : index
    %12 = vector.load %arg3[%c1_9, %c0_10] : memref<8x128xf32, #tpu.memory_space<vmem>>, vector<1x128xf32>
    %13 = arith.truncf %9 : vector<128x128xf32> to vector<128x128xbf16>
    %cst_11 = arith.constant dense<0.000000e+00> : vector<128x128xf32>
    %14 = tpu.matmul %13, %11, %cst_11 {dimension_numbers = #tpu.dot_dimension_numbers<[1], [0], [0], [1], [0, 0, 1, 1], [], []>} : vector<128x128xbf16>, vector<128x128xbf16>, vector<128x128xf32> -> vector<128x128xf32>
    %15 = vector.broadcast %12 : vector<1x128xf32> to vector<128x128xf32>
    %16 = arith.addf %14, %15 : vector<128x128xf32>
    %17 = arith.negf %16 : vector<128x128xf32>
    %18 = math.exp %17 : vector<128x128xf32>
    %cst_12 = arith.constant 1.000000e+00 : f32
    %19 = vector.broadcast %cst_12 : f32 to vector<128x128xf32>
    %20 = arith.addf %19, %18 : vector<128x128xf32>
    %21 = arith.divf %19, %20 : vector<128x128xf32>
    %c2 = arith.constant 2 : index
    %c0_13 = arith.constant 0 : index
    %c0_14 = arith.constant 0 : index
    %22 = vector.load %arg2[%c2, %c0_13, %c0_14] : memref<7x128x128xbf16, #tpu.memory_space<vmem>>, vector<1x128x128xbf16>
    %23 = vector.shape_cast %22 : vector<1x128x128xbf16> to vector<128x128xbf16>
    %c2_15 = arith.constant 2 : index
    %c0_16 = arith.constant 0 : index
    %24 = vector.load %arg3[%c2_15, %c0_16] : memref<8x128xf32, #tpu.memory_space<vmem>>, vector<1x128xf32>
    %25 = arith.truncf %21 : vector<128x128xf32> to vector<128x128xbf16>
    %cst_17 = arith.constant dense<0.000000e+00> : vector<128x128xf32>
    %26 = tpu.matmul %25, %23, %cst_17 {dimension_numbers = #tpu.dot_dimension_numbers<[1], [0], [0], [1], [0, 0, 1, 1], [], []>} : vector<128x128xbf16>, vector<128x128xbf16>, vector<128x128xf32> -> vector<128x128xf32>
    %27 = vector.broadcast %24 : vector<1x128xf32> to vector<128x128xf32>
    %28 = arith.addf %26, %27 : vector<128x128xf32>
    %cst_18 = arith.constant 0.000000e+00 : f32
    %29 = vector.broadcast %cst_18 : f32 to vector<128x128xf32>
    %30 = arith.maximumf %28, %29 : vector<128x128xf32>
    %c3 = arith.constant 3 : index
    %c0_19 = arith.constant 0 : index
    %c0_20 = arith.constant 0 : index
    %31 = vector.load %arg2[%c3, %c0_19, %c0_20] : memref<7x128x128xbf16, #tpu.memory_space<vmem>>, vector<1x128x128xbf16>
    %32 = vector.shape_cast %31 : vector<1x128x128xbf16> to vector<128x128xbf16>
    %c3_21 = arith.constant 3 : index
    %c0_22 = arith.constant 0 : index
    %33 = vector.load %arg3[%c3_21, %c0_22] : memref<8x128xf32, #tpu.memory_space<vmem>>, vector<1x128xf32>
    %34 = arith.truncf %30 : vector<128x128xf32> to vector<128x128xbf16>
    %cst_23 = arith.constant dense<0.000000e+00> : vector<128x128xf32>
    %35 = tpu.matmul %34, %32, %cst_23 {dimension_numbers = #tpu.dot_dimension_numbers<[1], [0], [0], [1], [0, 0, 1, 1], [], []>} : vector<128x128xbf16>, vector<128x128xbf16>, vector<128x128xf32> -> vector<128x128xf32>
    %36 = vector.broadcast %33 : vector<1x128xf32> to vector<128x128xf32>
    %37 = arith.addf %35, %36 : vector<128x128xf32>
    %38 = arith.negf %37 : vector<128x128xf32>
    %39 = math.exp %38 : vector<128x128xf32>
    %cst_24 = arith.constant 1.000000e+00 : f32
    %40 = vector.broadcast %cst_24 : f32 to vector<128x128xf32>
    %41 = arith.addf %40, %39 : vector<128x128xf32>
    %42 = arith.divf %40, %41 : vector<128x128xf32>
    %c4 = arith.constant 4 : index
    %c0_25 = arith.constant 0 : index
    %c0_26 = arith.constant 0 : index
    %43 = vector.load %arg2[%c4, %c0_25, %c0_26] : memref<7x128x128xbf16, #tpu.memory_space<vmem>>, vector<1x128x128xbf16>
    %44 = vector.shape_cast %43 : vector<1x128x128xbf16> to vector<128x128xbf16>
    %c4_27 = arith.constant 4 : index
    %c0_28 = arith.constant 0 : index
    %45 = vector.load %arg3[%c4_27, %c0_28] : memref<8x128xf32, #tpu.memory_space<vmem>>, vector<1x128xf32>
    %46 = arith.truncf %42 : vector<128x128xf32> to vector<128x128xbf16>
    %cst_29 = arith.constant dense<0.000000e+00> : vector<128x128xf32>
    %47 = tpu.matmul %46, %44, %cst_29 {dimension_numbers = #tpu.dot_dimension_numbers<[1], [0], [0], [1], [0, 0, 1, 1], [], []>} : vector<128x128xbf16>, vector<128x128xbf16>, vector<128x128xf32> -> vector<128x128xf32>
    %48 = vector.broadcast %45 : vector<1x128xf32> to vector<128x128xf32>
    %49 = arith.addf %47, %48 : vector<128x128xf32>
    %cst_30 = arith.constant 0.000000e+00 : f32
    %50 = vector.broadcast %cst_30 : f32 to vector<128x128xf32>
    %51 = arith.maximumf %49, %50 : vector<128x128xf32>
    %c5 = arith.constant 5 : index
    %c0_31 = arith.constant 0 : index
    %c0_32 = arith.constant 0 : index
    %52 = vector.load %arg2[%c5, %c0_31, %c0_32] : memref<7x128x128xbf16, #tpu.memory_space<vmem>>, vector<1x128x128xbf16>
    %53 = vector.shape_cast %52 : vector<1x128x128xbf16> to vector<128x128xbf16>
    %c5_33 = arith.constant 5 : index
    %c0_34 = arith.constant 0 : index
    %54 = vector.load %arg3[%c5_33, %c0_34] : memref<8x128xf32, #tpu.memory_space<vmem>>, vector<1x128xf32>
    %55 = arith.truncf %51 : vector<128x128xf32> to vector<128x128xbf16>
    %cst_35 = arith.constant dense<0.000000e+00> : vector<128x128xf32>
    %56 = tpu.matmul %55, %53, %cst_35 {dimension_numbers = #tpu.dot_dimension_numbers<[1], [0], [0], [1], [0, 0, 1, 1], [], []>} : vector<128x128xbf16>, vector<128x128xbf16>, vector<128x128xf32> -> vector<128x128xf32>
    %57 = vector.broadcast %54 : vector<1x128xf32> to vector<128x128xf32>
    %58 = arith.addf %56, %57 : vector<128x128xf32>
    %59 = arith.negf %58 : vector<128x128xf32>
    %60 = math.exp %59 : vector<128x128xf32>
    %cst_36 = arith.constant 1.000000e+00 : f32
    %61 = vector.broadcast %cst_36 : f32 to vector<128x128xf32>
    %62 = arith.addf %61, %60 : vector<128x128xf32>
    %63 = arith.divf %61, %62 : vector<128x128xf32>
    %c6 = arith.constant 6 : index
    %c0_37 = arith.constant 0 : index
    %c0_38 = arith.constant 0 : index
    %64 = vector.load %arg2[%c6, %c0_37, %c0_38] : memref<7x128x128xbf16, #tpu.memory_space<vmem>>, vector<1x128x128xbf16>
    %65 = vector.shape_cast %64 : vector<1x128x128xbf16> to vector<128x128xbf16>
    %c6_39 = arith.constant 6 : index
    %c0_40 = arith.constant 0 : index
    %66 = vector.load %arg3[%c6_39, %c0_40] : memref<8x128xf32, #tpu.memory_space<vmem>>, vector<1x128xf32>
    %67 = arith.truncf %63 : vector<128x128xf32> to vector<128x128xbf16>
    %cst_41 = arith.constant dense<0.000000e+00> : vector<128x128xf32>
    %68 = tpu.matmul %67, %65, %cst_41 {dimension_numbers = #tpu.dot_dimension_numbers<[1], [0], [0], [1], [0, 0, 1, 1], [], []>} : vector<128x128xbf16>, vector<128x128xbf16>, vector<128x128xf32> -> vector<128x128xf32>
    %69 = vector.broadcast %66 : vector<1x128xf32> to vector<128x128xf32>
    %70 = arith.addf %68, %69 : vector<128x128xf32>
    %71 = arith.negf %70 : vector<128x128xf32>
    %72 = math.exp %71 : vector<128x128xf32>
    %cst_42 = arith.constant 1.000000e+00 : f32
    %73 = vector.broadcast %cst_42 : f32 to vector<128x128xf32>
    %74 = arith.addf %73, %72 : vector<128x128xf32>
    %75 = arith.divf %73, %74 : vector<128x128xf32>
    %c0_43 = arith.constant 0 : index
    %c0_44 = arith.constant 0 : index
    %76 = vector.load %arg4[%c0_43, %c0_44] : memref<128x128xf32, #tpu.memory_space<vmem>>, vector<128x128xf32>
    tpu.vector_store %arg4[%c0_43, %c0_44], %75 {strides = array<i32>} : memref<128x128xf32, #tpu.memory_space<vmem>>, vector<128x128xf32>,
    return
  }
  func.func @transform_0(%arg0: i32) -> (i32, i32) {
    %c0_i32 = arith.constant 0 : i32
    %c0_i32_0 = arith.constant 0 : i32
    return %arg0, %c0_i32 : i32, i32
  }
  func.func @transform_1(%arg0: i32) -> (i32, i32, i32) {
    %c0_i32 = arith.constant 0 : i32
    %c0_i32_0 = arith.constant 0 : i32
    %c0_i32_1 = arith.constant 0 : i32
    %c0_i32_2 = arith.constant 0 : i32
    return %c0_i32, %c0_i32_0, %c0_i32_1 : i32, i32, i32
  }
  func.func @transform_2(%arg0: i32) -> (i32, i32) {
    %c0_i32 = arith.constant 0 : i32
    %c0_i32_0 = arith.constant 0 : i32
    %c0_i32_1 = arith.constant 0 : i32
    return %c0_i32, %c0_i32_0 : i32, i32
  }
  func.func @transform_3(%arg0: i32) -> (i32, i32) {
    %c0_i32 = arith.constant 0 : i32
    %c0_i32_0 = arith.constant 0 : i32
    return %arg0, %c0_i32 : i32, i32
  }
}

</mosaic_0001>

<bundles_post_ra>
// kernel: tpu_custom_call.1
= control target key start
LH: loop header
LB: loop body
LE: loop exit
PB: predicated region body
PF: predicated region fallthrough
CT: control target
= control target key end

     0   :  { %8 = vsyncpa [#allocation3], 0  ;;  %s2808_s0 = inlined_call_operand.hbm [shape: f32[128,128], index: 0, kind: input, shape index: {}]   ;;  %s2809_s1 = inlined_call_operand.hbm [shape: bf16[7,128,128], index: 1, kind: input, shape index: {}]   ;;  %s2810_s2 = inlined_call_operand.hbm [shape: f32[8,128], index: 2, kind: input, shape index: {}]   ;;  %s2811_s3 = inlined_call_operand.hbm [shape: f32[128,128], index: 3, kind: output, shape index: {}]  }
   0x1   :  { %9 = vsyncpa [#allocation6], 0 }
   0x2   :  { %10 = vsyncpa [#allocation4], 0  ;;  %s2654_s12 = smov [#allocation5]   ;;  %s2560_s16 = scalar_lea.hbm %s2809_s1, 7168 }
   0x3   :  { %s28_s13 = sshll.u32 %s2654_s12, 4  ;;  %p2561_p0 = scmp.ne.s32.totalorder %s2809_s1, %s2560_s16  ;;  %s29_s13 = int_to_ptr.vmem [resolvable:$true] %s28_s13 }
   0x4   :  { %p2564_p1 = scmp.lt.u32.totalorder %s2560_s16, %s2809_s1 }
   0x6   :  { %p2566_p2 = pnand %p2564_p1, %p2561_p0 }
   0x8   :  { %2569 = shalt.err (!%p2566_p2)
}
   0x9   :  { %s2570_s21 = scalar_lea.vmem %s29_s13, 7168  ;;  %p2575_p4 = scmp.lt.s32.totalorder %s29_s13, %s29_s13 }
   0xa   :  { %p2571_p3 = scmp.ne.s32.totalorder %s29_s13, %s2570_s21  ;;  %p2576_p5 = scmp.lt.s32.totalorder %s2570_s21, %s2570_s21 }
   0xc   :  { %p2577_p6 = por %p2576_p5, %p2575_p4 }
   0xe   :  { %p2578_p7 = pnand %p2577_p6, %p2571_p3 }
  0x10   :  { %2581 = shalt.err (!%p2578_p7)
}
  0x11   :  { %s2655_s22 = smov 64   ;;  %s2656_s23 = smov 4  }
  0x12   :  { %34 = dma.hbm_to_vmem [thread:$0]  %s2809_s1, 7168, %s29_s13, [#allocation6], %s2655_s22, %s2655_s22, %s2656_s23  }
  0x13   :  { %s2657_s26 = smov [#allocation2]   ;;  %s2582_s30 = scalar_lea.hbm %s2808_s0, 2048 }
  0x14   :  { %s16_s27 = sshll.u32 %s2657_s26, 4  ;;  %p2583_p8 = scmp.ne.s32.totalorder %s2808_s0, %s2582_s30  ;;  %s17_s27 = int_to_ptr.vmem [resolvable:$true] %s16_s27 }
  0x15   :  { %p2586_p9 = scmp.lt.u32.totalorder %s2582_s30, %s2808_s0 }
  0x17   :  { %p2588_p10 = pnand %p2586_p9, %p2583_p8 }
  0x19   :  { %2591 = shalt.err (!%p2588_p10)
}
  0x1a   :  { %s2592_s8 = scalar_lea.vmem %s17_s27, 2048  ;;  %p2597_p12 = scmp.lt.s32.totalorder %s17_s27, %s17_s27 }
  0x1b   :  { %p2593_p11 = scmp.ne.s32.totalorder %s17_s27, %s2592_s8  ;;  %p2598_p13 = scmp.lt.s32.totalorder %s2592_s8, %s2592_s8 }
  0x1d   :  { %p2599_p0 = por %p2598_p13, %p2597_p12 }
  0x1f   :  { %p2600_p1 = pnand %p2599_p0, %p2593_p11 }
  0x21   :  { %2603 = shalt.err (!%p2600_p1)
}
  0x22   :  { %s2658_s1 = smov 128   ;;  %s2659_s9 = smov 8  }
  0x23   :  { %22 = dma.hbm_to_vmem [thread:$0]  %s2808_s0, 2048, %s17_s27, [#allocation3], %s2658_s1, %s2658_s1, %s2659_s9  }
  0x24   :  { %s2660_s12 = smov [#allocation7]   ;;  %s2604_s16 = scalar_lea.hbm %s2810_s2, 128 }
  0x25   :  { %s41_s13 = sshll.u32 %s2660_s12, 4  ;;  %p2605_p2 = scmp.ne.s32.totalorder %s2810_s2, %s2604_s16  ;;  %s42_s13 = int_to_ptr.vmem [resolvable:$true] %s41_s13 }
  0x26   :  { %p2608_p3 = scmp.lt.u32.totalorder %s2604_s16, %s2810_s2 }
  0x28   :  { %p2610_p4 = pnand %p2608_p3, %p2605_p2 }
  0x2a   :  { %2613 = shalt.err (!%p2610_p4)
}
  0x2b   :  { %s2614_s21 = scalar_lea.vmem %s42_s13, 128  ;;  %p2619_p6 = scmp.lt.s32.totalorder %s42_s13, %s42_s13 }
  0x2c   :  { %p2615_p5 = scmp.ne.s32.totalorder %s42_s13, %s2614_s21  ;;  %p2620_p7 = scmp.lt.s32.totalorder %s2614_s21, %s2614_s21 }
  0x2e   :  { %p2621_p8 = por %p2620_p7, %p2619_p6 }
  0x30   :  { %p2622_p9 = pnand %p2621_p8, %p2615_p5 }
  0x32   :  { %2625 = shalt.err (!%p2622_p9)
}
  0x33   :  { %44 = dma.hbm_to_vmem [thread:$0]  %s2810_s2, 128, %s42_s13, [#allocation6]  }
  0x34   :  { %2648 = dma.done.wait [#allocation3], 2048  }
  0x35   :  { %2649 = vsyncadd [#allocation3], 4294965248 }
  0x36   :  { %2650 = dma.done.wait [#allocation6], 7296  }
  0x37   :  { %2651 = vsyncadd [#allocation6], 4294960000  ;;  %v2248_v0 = vld [vmem:[#allocation5] sm:$0xff]   ;;  %v2249_v1 = vld [vmem:[#allocation5 + $0x8] sm:$0xff]   ;;  %s2661_s2 = smov [#allocation8]  }
  0x38   :  { %2000 = vmatprep.subr.bf16.mxu0 %v2248_v0  ;;  %v2250_v2 = vld [vmem:[#allocation5 + $0x10] sm:$0xff]   ;;  %v2251_v3 = vld [vmem:[#allocation5 + $0x18] sm:$0xff]   ;;  %v55_v4 = vld [vmem:[#allocation2] sm:$0xff]  ;;  %s1748_s23 = sshll.u32 %s2661_s2, 4  ;;  %s1749_s23 = int_to_ptr.vmem [resolvable:$true] %s1748_s23 }
  0x39   :  { %2001 = vmatpush3.bf16.msra.mxu0 %v2248_v0  ;;  %v56_v5 = vld [vmem:[#allocation2 + $0x8] sm:$0xff]  ;;  %v2252_v7 = vld [vmem:[#allocation5 + $0x20] sm:$0xff]   ;;  %v2258_v11 = vld [vmem:[#allocation5 + $0x50] sm:$0xff]   ;;  %s2626_s24 = scalar_lea.vmem %s1749_s23, 2048  ;;  %p2631_p11 = scmp.lt.s32.totalorder %s1749_s23, %s1749_s23 }
  0x3a   :  { %2002 = vmatprep.subr.bf16.mxu0 %v2249_v1  ;;  %v88_v6 = vpack.c.bf16 %v56_v5, %v55_v4  ;;  %v2256_v8 = vld [vmem:[#allocation5 + $0x40] sm:$0xff]   ;;  %v2257_v9 = vld [vmem:[#allocation5 + $0x48] sm:$0xff]   ;;  %v2254_v12 = vld [vmem:[#allocation5 + $0x30] sm:$0xff]   ;;  %p2627_p10 = scmp.ne.s32.totalorder %s1749_s23, %s2626_s24  ;;  %p2632_p12 = scmp.lt.s32.totalorder %s2626_s24, %s2626_s24 }
  0x3b   :  { %v2253_v10 = vld [vmem:[#allocation5 + $0x28] sm:$0xff]   ;;  %2032 = vmatprep.subr.bf16.mxu1 %v2256_v8  ;;  %v2259_v13 = vld [vmem:[#allocation5 + $0x58] sm:$0xff]   ;;  %v2260_v15 = vld [vmem:[#allocation5 + $0x60] sm:$0xff]  }
  0x3c   :  { %2016 = vmatprep.mubr.bf16.mxu0 %v88_v6  ;;  %2033 = vmatpush3.bf16.msra.mxu1 %v2256_v8  ;;  %v2255_v14 = vld [vmem:[#allocation5 + $0x38] sm:$0xff]   ;;  %v57_v16 = vld [vmem:[#allocation2 + $0x10] sm:$0xff]  ;;  %v59_v18 = vld [vmem:[#allocation2 + $0x20] sm:$0xff]  ;;  %p2633_p13 = por %p2632_p12, %p2631_p11 }
  0x3d   :  { %2003 = vmatpush3.bf16.msra.mxu0 %v2249_v1  ;;  %2034 = vmatprep.subr.bf16.mxu1 %v2257_v9  ;;  %v58_v17 = vld [vmem:[#allocation2 + $0x18] sm:$0xff]  ;;  %v60_v19 = vld [vmem:[#allocation2 + $0x28] sm:$0xff]  ;;  %v61_v23 = vld [vmem:[#allocation2 + $0x30] sm:$0xff] }
  0x3e   :  { %2004 = vmatprep.subr.bf16.mxu0 %v2250_v2  ;;  %v2261_v20 = vld [vmem:[#allocation5 + $0x68] sm:$0xff]   ;;  %v89_v21 = vpack.c.bf16 %v58_v17, %v57_v16  ;;  %v90_v22 = vpack.c.bf16 %v60_v19, %v59_v18  ;;  %v62_v24 = vld [vmem:[#allocation2 + $0x38] sm:$0xff]  ;;  %v63_v25 = vld [vmem:[#allocation2 + $0x40] sm:$0xff]  ;;  %p2634_p0 = pnand %p2633_p13, %p2627_p10 }
  0x3f   :  { %v64_v26 = vld [vmem:[#allocation2 + $0x48] sm:$0xff]  ;;  %v91_v27 = vpack.c.bf16 %v62_v24, %v61_v23  ;;  %v65_v29 = vld [vmem:[#allocation2 + $0x50] sm:$0xff]  ;;  %v66_v30 = vld [vmem:[#allocation2 + $0x58] sm:$0xff] }
  0x40   :  { %2035 = vmatpush3.bf16.msra.mxu1 %v2257_v9  ;;  %v92_v28 = vpack.c.bf16 %v64_v26, %v63_v25  ;;  %v67_v31 = vld [vmem:[#allocation2 + $0x60] sm:$0xff]  ;;  %v68_v32 = vld [vmem:[#allocation2 + $0x68] sm:$0xff]  ;;  %v93_v33 = vpack.c.bf16 %v66_v30, %v65_v29  ;;  %v69_v35 = vld [vmem:[#allocation2 + $0x70] sm:$0xff] }
  0x41   :  { %2005 = vmatpush3.bf16.msra.mxu0 %v2250_v2  ;;  %2036 = vmatprep.subr.bf16.mxu1 %v2258_v11  ;;  %v94_v34 = vpack.c.bf16 %v68_v32, %v67_v31  ;;  %v70_v36 = vld [vmem:[#allocation2 + $0x78] sm:$0xff]  ;;  %v2262_v38 = vld [vmem:[#allocation5 + $0x70] sm:$0xff]   ;;  %v1761_v40 = vld [vmem:[#allocation7] ss:$0 sm:$0xff] }
  0x42   :  { %2006 = vmatprep.subr.bf16.mxu0 %v2251_v3  ;;  %v95_v37 = vpack.c.bf16 %v70_v36, %v69_v35  ;;  %v2263_v39 = vld [vmem:[#allocation5 + $0x78] sm:$0xff]   ;;  %v2266_v35 = vld [vmem:[#allocation5 + $0x90] sm:$0xff]  }
  0x43   :  { %v2267_v36 = vld [vmem:[#allocation5 + $0x98] sm:$0xff]  }
  0x44   :  { %2037 = vmatpush3.bf16.msra.mxu1 %v2258_v11 }
  0x45   :  { %2007 = vmatpush3.bf16.msra.mxu0 %v2251_v3  ;;  %2038 = vmatprep.subr.bf16.mxu1 %v2259_v13 }
  0x46   :  { %2008 = vmatprep.subr.bf16.mxu0 %v2252_v7 }
  0x48   :  { %2039 = vmatpush3.bf16.msra.mxu1 %v2259_v13 }
  0x49   :  { %2009 = vmatpush3.bf16.msra.mxu0 %v2252_v7  ;;  %2040 = vmatprep.subr.bf16.mxu1 %v2260_v15 }
  0x4a   :  { %2010 = vmatprep.subr.bf16.mxu0 %v2253_v10 }
  0x4c   :  { %2041 = vmatpush3.bf16.msra.mxu1 %v2260_v15 }
  0x4d   :  { %2011 = vmatpush3.bf16.msra.mxu0 %v2253_v10  ;;  %2042 = vmatprep.subr.bf16.mxu1 %v2261_v20 }
  0x4e   :  { %2012 = vmatprep.subr.bf16.mxu0 %v2254_v12 }
  0x50   :  { %2043 = vmatpush3.bf16.msra.mxu1 %v2261_v20 }
  0x51   :  { %2013 = vmatpush3.bf16.msra.mxu0 %v2254_v12  ;;  %2044 = vmatprep.subr.bf16.mxu1 %v2262_v38 }
  0x52   :  { %2014 = vmatprep.subr.bf16.mxu0 %v2255_v14 }
  0x54   :  { %2045 = vmatpush3.bf16.msra.mxu1 %v2262_v38  ;;  %v2269_v38 = vld [vmem:[#allocation5 + $0xa8] sm:$0xff]  }
  0x55   :  { %2015 = vmatpush3.bf16.msra.mxu0 %v2255_v14  ;;  %2046 = vmatprep.subr.bf16.mxu1 %v2263_v39 }
  0x58   :  { %2017 = vmatmul.mubr.bf16.vlgmr.msra.gmra.mrb[0].mxu0 %v89_v21  ;;  %2047 = vmatpush3.bf16.msra.mxu1 %v2263_v39  ;;  %v2270_v39 = vld [vmem:[#allocation5 + $0xb0] sm:$0xff]  }
  0x59   :  { %2020 = vmatprep.mubr.bf16.mxu0 %v90_v22 }
  0x60   :  { %2021 = vmatmul.mubr.bf16.gmra.mrb[4].mxu0 %v91_v27 }
  0x61   :  { %2024 = vmatprep.mubr.bf16.mxu0 %v92_v28 }
  0x68   :  { %2025 = vmatmul.mubr.bf16.gmra.mrb[8].mxu0 %v93_v33  ;;  %v2264_v33 = vld [vmem:[#allocation5 + $0x80] sm:$0xff]  }
  0x69   :  { %2028 = vmatprep.mubr.bf16.mxu0 %v94_v34  ;;  %2064 = vmatprep.subr.bf16.mxu0 %v2264_v33  ;;  %v2265_v34 = vld [vmem:[#allocation5 + $0x88] sm:$0xff]  }
  0x6a   :  { %2065 = vmatpush3.bf16.msra.mxu0 %v2264_v33 }
  0x6b   :  { %2066 = vmatprep.subr.bf16.mxu0 %v2265_v34 }
  0x6e   :  { %2067 = vmatpush3.bf16.msra.mxu0 %v2265_v34 }
  0x6f   :  { %2068 = vmatprep.subr.bf16.mxu0 %v2266_v35 }
  0x70   :  { %2029 = vmatmul.mubr.bf16.gmra.mrb[12].mxu0 %v95_v37  ;;  %v2268_v37 = vld [vmem:[#allocation5 + $0xa0] sm:$0xff]  }
  0x72   :  { %2069 = vmatpush3.bf16.msra.mxu0 %v2266_v35 }
  0x73   :  { %2070 = vmatprep.subr.bf16.mxu0 %v2267_v36 }
  0x76   :  { %2071 = vmatpush3.bf16.msra.mxu0 %v2267_v36 }
  0x77   :  { %2072 = vmatprep.subr.bf16.mxu0 %v2268_v37 }
  0x7a   :  { %2073 = vmatpush3.bf16.msra.mxu0 %v2268_v37 }
  0x7b   :  { %2074 = vmatprep.subr.bf16.mxu0 %v2269_v38 }
  0x7e   :  { %2075 = vmatpush3.bf16.msra.mxu0 %v2269_v38 }
  0x7f   :  { %2076 = vmatprep.subr.bf16.mxu0 %v2270_v39 }
  0x82   :  { %2077 = vmatpush3.bf16.msra.mxu0 %v2270_v39 }
 0x12b   :  { %v2018_v41 = vpop.f32.mrb[0].mxu0 }
 0x12c   :  { %v191_v42 = vadd.f32 %v2018_v41, %v1761_v40  ;;  %v182_v43 = vpop.f32.mrb[1].mxu0  ;;  %v2272_v41 = vld [vmem:[#allocation5 + $0xc0] sm:$0xff]  }
 0x12d   :  { %v183_v44 = vadd.f32 %v1761_v40, %v182_v43  ;;  %v2019_v45 = vpop.f32.mrb[2].mxu0  ;;  %2096 = vmatprep.subr.bf16.mxu1 %v2272_v41  ;;  %v2274_v43 = vld [vmem:[#allocation5 + $0xd0] sm:$0xff]  }
 0x12e   :  { %v194_v46 = vadd.f32 %v2019_v45, %v1761_v40  ;;  %v185_v47 = vpop.f32.mrb[3].mxu0  ;;  %v247_v49 = vmax.f32 %v191_v42, 0.0  ;;  %v2273_v42 = vld [vmem:[#allocation5 + $0xc8] sm:$0xff]   ;;  %v2276_v45 = vld [vmem:[#allocation5 + $0xe0] sm:$0xff]  }
 0x12f   :  { %v186_v48 = vadd.f32 %v1761_v40, %v185_v47  ;;  %v245_v51 = vmax.f32 %v183_v44, 0.0  ;;  %v2275_v44 = vld [vmem:[#allocation5 + $0xd8] sm:$0xff]   ;;  %v2721_v47 = vld [vmem:[#allocation7 + $0x1] ss:$0 sm:$0xff] }
 0x130   :  { %v248_v50 = vmax.f32 %v194_v46, 0.0  ;;  %v2277_v46 = vld [vmem:[#allocation5 + $0xe8] sm:$0xff]  }
 0x131   :  { %v246_v52 = vmax.f32 %v186_v48, 0.0 }
 0x132   :  { %v280_v53 = vpack.c.bf16 %v248_v50, %v247_v49 }
 0x133   :  { %v2022_v54 = vpop.f32.mrb[4].mxu0  ;;  %v279_v55 = vpack.c.bf16 %v246_v52, %v245_v51 }
 0x134   :  { %v207_v56 = vadd.f32 %v2022_v54, %v1761_v40  ;;  %v198_v57 = vpop.f32.mrb[5].mxu0 }
 0x135   :  { %v199_v58 = vadd.f32 %v1761_v40, %v198_v57  ;;  %v2023_v59 = vpop.f32.mrb[6].mxu0  ;;  %2048 = vmatprep.mubr.bf16.mxu1 %v279_v55 }
 0x136   :  { %v210_v60 = vadd.f32 %v2023_v59, %v1761_v40  ;;  %v201_v61 = vpop.f32.mrb[7].mxu0  ;;  %2049 = vmatmul.mubr.bf16.vlgmr.msra.gmra.mrb[0].mxu1 %v280_v53  ;;  %v251_v63 = vmax.f32 %v207_v56, 0.0 }
 0x137   :  { %v202_v62 = vadd.f32 %v1761_v40, %v201_v61  ;;  %v249_v1 = vmax.f32 %v199_v58, 0.0  ;;  %2097 = vmatpush3.bf16.msra.mxu1 %v2272_v41 }
 0x138   :  { %v252_v0 = vmax.f32 %v210_v60, 0.0  ;;  %2098 = vmatprep.subr.bf16.mxu1 %v2273_v42 }
 0x139   :  { %v250_v2 = vmax.f32 %v202_v62, 0.0 }
 0x13a   :  { %v282_v3 = vpack.c.bf16 %v252_v0, %v251_v63 }
 0x13b   :  { %v281_v4 = vpack.c.bf16 %v250_v2, %v249_v1  ;;  %v2026_v5 = vpop.f32.mrb[8].mxu0  ;;  %2099 = vmatpush3.bf16.msra.mxu1 %v2273_v42 }
 0x13c   :  { %v223_v6 = vadd.f32 %v2026_v5, %v1761_v40  ;;  %v214_v7 = vpop.f32.mrb[9].mxu0  ;;  %2100 = vmatprep.subr.bf16.mxu1 %v2274_v43 }
 0x13d   :  { %v215_v8 = vadd.f32 %v1761_v40, %v214_v7  ;;  %v2027_v9 = vpop.f32.mrb[10].mxu0  ;;  %2052 = vmatprep.mubr.bf16.mxu1 %v281_v4 }
 0x13e   :  { %v226_v10 = vadd.f32 %v2027_v9, %v1761_v40  ;;  %v217_v11 = vpop.f32.mrb[11].mxu0  ;;  %2053 = vmatmul.mubr.bf16.gmra.mrb[4].mxu1 %v282_v3  ;;  %v255_v13 = vmax.f32 %v223_v6, 0.0 }
 0x13f   :  { %v218_v12 = vadd.f32 %v1761_v40, %v217_v11  ;;  %v253_v15 = vmax.f32 %v215_v8, 0.0  ;;  %2101 = vmatpush3.bf16.msra.mxu1 %v2274_v43 }
 0x140   :  { %v256_v14 = vmax.f32 %v226_v10, 0.0  ;;  %2102 = vmatprep.subr.bf16.mxu1 %v2275_v44 }
 0x141   :  { %v254_v16 = vmax.f32 %v218_v12, 0.0 }
 0x142   :  { %v284_v17 = vpack.c.bf16 %v256_v14, %v255_v13 }
 0x143   :  { %v283_v18 = vpack.c.bf16 %v254_v16, %v253_v15  ;;  %v2030_v19 = vpop.f32.mrb[12].mxu0  ;;  %2103 = vmatpush3.bf16.msra.mxu1 %v2275_v44 }
 0x144   :  { %v239_v20 = vadd.f32 %v2030_v19, %v1761_v40  ;;  %v230_v21 = vpop.f32.mrb[13].mxu0  ;;  %2104 = vmatprep.subr.bf16.mxu1 %v2276_v45 }
 0x145   :  { %v231_v22 = vadd.f32 %v1761_v40, %v230_v21  ;;  %v2031_v23 = vpop.f32.mrb[14].mxu0  ;;  %2056 = vmatprep.mubr.bf16.mxu1 %v283_v18 }
 0x146   :  { %v242_v24 = vadd.f32 %v2031_v23, %v1761_v40  ;;  %v233_v25 = vpop.f32.mrb[15].mxu0  ;;  %2057 = vmatmul.mubr.bf16.gmra.mrb[8].mxu1 %v284_v17  ;;  %v259_v27 = vmax.f32 %v239_v20, 0.0 }
 0x147   :  { %v234_v26 = vadd.f32 %v1761_v40, %v233_v25  ;;  %v257_v29 = vmax.f32 %v231_v22, 0.0  ;;  %v2271_v40 = vld [vmem:[#allocation5 + $0xb8] sm:$0xff]   ;;  %2105 = vmatpush3.bf16.msra.mxu1 %v2276_v45 }
 0x148   :  { %v260_v28 = vmax.f32 %v242_v24, 0.0  ;;  %2078 = vmatprep.subr.bf16.mxu0 %v2271_v40  ;;  %2106 = vmatprep.subr.bf16.mxu1 %v2277_v46 }
 0x149   :  { %v258_v30 = vmax.f32 %v234_v26, 0.0  ;;  %2079 = vmatpush3.bf16.msra.mxu0 %v2271_v40 }
 0x14a   :  { %v286_v31 = vpack.c.bf16 %v260_v28, %v259_v27 }
 0x14b   :  { %v285_v32 = vpack.c.bf16 %v258_v30, %v257_v29  ;;  %2107 = vmatpush3.bf16.msra.mxu1 %v2277_v46 }
 0x14d   :  { %2060 = vmatprep.mubr.bf16.mxu1 %v285_v32 }
 0x14e   :  { %2061 = vmatmul.mubr.bf16.gmra.mrb[12].mxu1 %v286_v31 }
 0x209   :  { %v2050_v48 = vpop.f32.mrb[0].mxu1 }
 0x20a   :  { %v382_v49 = vadd.f32 %v2050_v48, %v2721_v47  ;;  %v373_v50 = vpop.f32.mrb[1].mxu1 }
 0x20b   :  { %v374_v51 = vadd.f32 %v2721_v47, %v373_v50  ;;  %v2051_v52 = vpop.f32.mrb[2].mxu1 }
 0x20c   :  { %v1781_v53 = vmul.f32 -1.442695, %v382_v49  ;;  %v385_v54 = vadd.f32 %v2051_v52, %v2721_v47  ;;  %v376_v55 = vpop.f32.mrb[3].mxu1 }
 0x20d   :  { %v1779_v56 = vmul.f32 -1.442695, %v374_v51  ;;  %v377_v57 = vadd.f32 %v2721_v47, %v376_v55 }
 0x20e   :  { %2304 = vpow2.f32 %v1781_v53  ;;  %v1782_v58 = vmul.f32 -1.442695, %v385_v54 }
 0x20f   :  { %2306 = vpow2.f32 %v1779_v56  ;;  %v1780_v59 = vmul.f32 -1.442695, %v377_v57 }
 0x210   :  { %2308 = vpow2.f32 %v1782_v58 }
 0x211   :  { %2310 = vpow2.f32 %v1780_v59  ;;  %v2054_v60 = vpop.f32.mrb[4].mxu1 }
 0x212   :  { %v398_v61 = vadd.f32 %v2054_v60, %v2721_v47  ;;  %v389_v62 = vpop.f32.mrb[5].mxu1 }
 0x213   :  { %v390_v63 = vadd.f32 %v2721_v47, %v389_v62  ;;  %v2055_v0 = vpop.f32.mrb[6].mxu1 }
 0x214   :  { %v1785_v1 = vmul.f32 -1.442695, %v398_v61  ;;  %v401_v2 = vadd.f32 %v2055_v0, %v2721_v47  ;;  %v392_v3 = vpop.f32.mrb[7].mxu1 }
 0x215   :  { %v1783_v4 = vmul.f32 -1.442695, %v390_v63  ;;  %v393_v5 = vadd.f32 %v2721_v47, %v392_v3 }
 0x216   :  { %2312 = vpow2.f32 %v1785_v1  ;;  %v1786_v6 = vmul.f32 -1.442695, %v401_v2 }
 0x217   :  { %2314 = vpow2.f32 %v1783_v4  ;;  %v1784_v7 = vmul.f32 -1.442695, %v393_v5 }
 0x218   :  { %v2305_v8 = vpop.eup %2304  ;;  %2316 = vpow2.f32 %v1786_v6 }
 0x219   :  { %v2307_v9 = vpop.eup %2306  ;;  %v486_v10 = vadd.f32 1.0, %v2305_v8  ;;  %2318 = vpow2.f32 %v1784_v7  ;;  %v2058_v11 = vpop.f32.mrb[8].mxu1 }
 0x21a   :  { %v2309_v12 = vpop.eup %2308  ;;  %v484_v13 = vadd.f32 1.0, %v2307_v9  ;;  %v414_v14 = vadd.f32 %v2058_v11, %v2721_v47  ;;  %v405_v15 = vpop.f32.mrb[9].mxu1 }
 0x21b   :  { %v2311_v16 = vpop.eup %2310  ;;  %2320 = vrcp.f32 %v486_v10  ;;  %v487_v17 = vadd.f32 1.0, %v2309_v12  ;;  %v406_v18 = vadd.f32 %v2721_v47, %v405_v15  ;;  %v2059_v19 = vpop.f32.mrb[10].mxu1 }
 0x21c   :  { %2322 = vrcp.f32 %v484_v13  ;;  %v485_v20 = vadd.f32 1.0, %v2311_v16  ;;  %v1789_v21 = vmul.f32 -1.442695, %v414_v14  ;;  %v417_v22 = vadd.f32 %v2059_v19, %v2721_v47  ;;  %v408_v23 = vpop.f32.mrb[11].mxu1 }
 0x21d   :  { %2324 = vrcp.f32 %v487_v17  ;;  %v1787_v24 = vmul.f32 -1.442695, %v406_v18  ;;  %v409_v25 = vadd.f32 %v2721_v47, %v408_v23 }
 0x21e   :  { %2326 = vrcp.f32 %v485_v20  ;;  %v1790_v26 = vmul.f32 -1.442695, %v417_v22 }
 0x21f   :  { %2328 = vpow2.f32 %v1789_v21  ;;  %v1788_v27 = vmul.f32 -1.442695, %v409_v25  ;;  %v2279_v25 = vld [vmem:[#allocation5 + $0xf8] sm:$0xff]  }
 0x220   :  { %v2313_v28 = vpop.eup %2312  ;;  %2330 = vpow2.f32 %v1787_v24  ;;  %v2278_v24 = vld [vmem:[#allocation5 + $0xf0] sm:$0xff]  }
 0x221   :  { %v2315_v29 = vpop.eup %2314  ;;  %v490_v30 = vadd.f32 1.0, %v2313_v28  ;;  %2332 = vpow2.f32 %v1790_v26  ;;  %v2062_v31 = vpop.f32.mrb[12].mxu1  ;;  %2108 = vmatprep.subr.bf16.mxu1 %v2278_v24  ;;  %v1795_v26 = vld [vmem:[#allocation7 + $0x2] ss:$0 sm:$0xff] }
 0x222   :  { %v2317_v32 = vpop.eup %2316  ;;  %v488_v33 = vadd.f32 1.0, %v2315_v29  ;;  %2334 = vpow2.f32 %v1788_v27  ;;  %v430_v34 = vadd.f32 %v2062_v31, %v2721_v47  ;;  %v421_v35 = vpop.f32.mrb[13].mxu1  ;;  %2109 = vmatpush3.bf16.msra.mxu1 %v2278_v24  ;;  %v2285_v24 = vld [vmem:[#allocation5 + $0x128] sm:$0xff]  }
 0x223   :  { %v2319_v36 = vpop.eup %2318  ;;  %2336 = vrcp.f32 %v490_v30  ;;  %v491_v37 = vadd.f32 1.0, %v2317_v32  ;;  %v422_v38 = vadd.f32 %v2721_v47, %v421_v35  ;;  %v2063_v39 = vpop.f32.mrb[14].mxu1  ;;  %2110 = vmatprep.subr.bf16.mxu1 %v2279_v25 }
 0x224   :  { %2338 = vrcp.f32 %v488_v33  ;;  %v489_v40 = vadd.f32 1.0, %v2319_v36  ;;  %v1793_v41 = vmul.f32 -1.442695, %v430_v34  ;;  %v433_v42 = vadd.f32 %v2063_v39, %v2721_v47  ;;  %v424_v43 = vpop.f32.mrb[15].mxu1 }
 0x225   :  { %v2321_v44 = vpop.eup %2320  ;;  %2340 = vrcp.f32 %v491_v37  ;;  %v1791_v45 = vmul.f32 -1.442695, %v422_v38  ;;  %v425_v46 = vadd.f32 %v2721_v47, %v424_v43 }
 0x226   :  { %v2323_v48 = vpop.eup %2322  ;;  %2342 = vrcp.f32 %v489_v40  ;;  %v1794_v49 = vmul.f32 -1.442695, %v433_v42  ;;  %2111 = vmatpush3.bf16.msra.mxu1 %v2279_v25  ;;  %v2286_v25 = vld [vmem:[#allocation5 + $0x130] sm:$0xff]  }
 0x227   :  { %v2325_v50 = vpop.eup %2324  ;;  %2344 = vpow2.f32 %v1793_v41  ;;  %v1792_v51 = vmul.f32 -1.442695, %v425_v46 }
 0x228   :  { %v2327_v52 = vpop.eup %2326  ;;  %2346 = vpow2.f32 %v1791_v45  ;;  %v551_v53 = vpack.c.bf16 %v2325_v50, %v2321_v44 }
 0x229   :  { %v2329_v54 = vpop.eup %2328  ;;  %2348 = vpow2.f32 %v1794_v49  ;;  %v550_v55 = vpack.c.bf16 %v2327_v52, %v2323_v48 }
 0x22a   :  { %v2331_v56 = vpop.eup %2330  ;;  %v494_v57 = vadd.f32 1.0, %v2329_v54  ;;  %2350 = vpow2.f32 %v1792_v51 }
 0x22b   :  { %v2333_v58 = vpop.eup %2332  ;;  %v492_v59 = vadd.f32 1.0, %v2331_v56  ;;  %2080 = vmatprep.mubr.bf16.mxu0 %v550_v55 }
 0x22c   :  { %v2335_v60 = vpop.eup %2334  ;;  %2352 = vrcp.f32 %v494_v57  ;;  %v495_v47 = vadd.f32 1.0, %v2333_v58  ;;  %2081 = vmatmul.mubr.bf16.vlgmr.msra.gmra.mrb[16].mxu0 %v551_v53 }
 0x22d   :  { %v2337_v61 = vpop.eup %2336  ;;  %2354 = vrcp.f32 %v492_v59  ;;  %v493_v62 = vadd.f32 1.0, %v2335_v60 }
 0x22e   :  { %v2339_v63 = vpop.eup %2338  ;;  %2356 = vrcp.f32 %v495_v47 }
 0x22f   :  { %v2341_v0 = vpop.eup %2340  ;;  %2358 = vrcp.f32 %v493_v62 }
 0x230   :  { %v2343_v1 = vpop.eup %2342  ;;  %v553_v2 = vpack.c.bf16 %v2341_v0, %v2337_v61 }
 0x231   :  { %v2345_v3 = vpop.eup %2344  ;;  %v552_v4 = vpack.c.bf16 %v2343_v1, %v2339_v63 }
 0x232   :  { %v2347_v5 = vpop.eup %2346  ;;  %v498_v6 = vadd.f32 1.0, %v2345_v3 }
 0x233   :  { %v2349_v7 = vpop.eup %2348  ;;  %v496_v8 = vadd.f32 1.0, %v2347_v5  ;;  %2084 = vmatprep.mubr.bf16.mxu0 %v552_v4 }
 0x234   :  { %v2351_v9 = vpop.eup %2350  ;;  %2360 = vrcp.f32 %v498_v6  ;;  %v499_v10 = vadd.f32 1.0, %v2349_v7  ;;  %2085 = vmatmul.mubr.bf16.gmra.mrb[20].mxu0 %v553_v2 }
 0x235   :  { %2362 = vrcp.f32 %v496_v8  ;;  %v497_v11 = vadd.f32 1.0, %v2351_v9 }
 0x236   :  { %v2353_v12 = vpop.eup %2352  ;;  %2364 = vrcp.f32 %v499_v10 }
 0x237   :  { %v2355_v13 = vpop.eup %2354  ;;  %2366 = vrcp.f32 %v497_v11 }
 0x238   :  { %v2357_v14 = vpop.eup %2356 }
 0x239   :  { %v2359_v15 = vpop.eup %2358  ;;  %v555_v16 = vpack.c.bf16 %v2357_v14, %v2353_v12 }
 0x23a   :  { %v554_v17 = vpack.c.bf16 %v2359_v15, %v2355_v13 }
 0x23c   :  { %2088 = vmatprep.mubr.bf16.mxu0 %v554_v17 }
 0x23d   :  { %2089 = vmatmul.mubr.bf16.gmra.mrb[24].mxu0 %v555_v16 }
 0x23e   :  { %v2361_v18 = vpop.eup %2360 }
 0x23f   :  { %v2363_v19 = vpop.eup %2362 }
 0x240   :  { %v2365_v20 = vpop.eup %2364 }
 0x241   :  { %v2367_v21 = vpop.eup %2366  ;;  %v557_v22 = vpack.c.bf16 %v2365_v20, %v2361_v18  ;;  %v2281_v20 = vld [vmem:[#allocation5 + $0x108] sm:$0xff]  }
 0x242   :  { %v556_v23 = vpack.c.bf16 %v2367_v21, %v2363_v19  ;;  %v2280_v19 = vld [vmem:[#allocation5 + $0x100] sm:$0xff]   ;;  %v2282_v21 = vld [vmem:[#allocation5 + $0x110] sm:$0xff]  }
 0x243   :  { %2128 = vmatprep.subr.bf16.mxu0 %v2280_v19 }
 0x244   :  { %2092 = vmatprep.mubr.bf16.mxu0 %v556_v23  ;;  %2129 = vmatpush3.bf16.msra.mxu0 %v2280_v19  ;;  %v2284_v23 = vld [vmem:[#allocation5 + $0x120] sm:$0xff]  }
 0x245   :  { %2093 = vmatmul.mubr.bf16.gmra.mrb[28].mxu0 %v557_v22  ;;  %2130 = vmatprep.subr.bf16.mxu0 %v2281_v20  ;;  %v2283_v22 = vld [vmem:[#allocation5 + $0x118] sm:$0xff]  }
 0x248   :  { %2131 = vmatpush3.bf16.msra.mxu0 %v2281_v20 }
 0x249   :  { %2132 = vmatprep.subr.bf16.mxu0 %v2282_v21 }
 0x24c   :  { %2133 = vmatpush3.bf16.msra.mxu0 %v2282_v21 }
 0x24d   :  { %2134 = vmatprep.subr.bf16.mxu0 %v2283_v22 }
 0x250   :  { %2135 = vmatpush3.bf16.msra.mxu0 %v2283_v22 }
 0x251   :  { %2136 = vmatprep.subr.bf16.mxu0 %v2284_v23 }
 0x254   :  { %2137 = vmatpush3.bf16.msra.mxu0 %v2284_v23 }
 0x255   :  { %2138 = vmatprep.subr.bf16.mxu0 %v2285_v24 }
 0x258   :  { %2139 = vmatpush3.bf16.msra.mxu0 %v2285_v24 }
 0x259   :  { %2140 = vmatprep.subr.bf16.mxu0 %v2286_v25 }
 0x25c   :  { %2141 = vmatpush3.bf16.msra.mxu0 %v2286_v25 }
 0x2ff   :  { %v2082_v27 = vpop.f32.mrb[16].mxu0 }
 0x300   :  { %v653_v28 = vadd.f32 %v2082_v27, %v1795_v26  ;;  %v644_v29 = vpop.f32.mrb[17].mxu0  ;;  %v2288_v27 = vld [vmem:[#allocation5 + $0x140] sm:$0xff]  }
 0x301   :  { %v645_v30 = vadd.f32 %v1795_v26, %v644_v29  ;;  %v2083_v31 = vpop.f32.mrb[18].mxu0  ;;  %2160 = vmatprep.subr.bf16.mxu1 %v2288_v27  ;;  %v2290_v29 = vld [vmem:[#allocation5 + $0x150] sm:$0xff]  }
 0x302   :  { %v656_v32 = vadd.f32 %v2083_v31, %v1795_v26  ;;  %v647_v33 = vpop.f32.mrb[19].mxu0  ;;  %v709_v35 = vmax.f32 %v653_v28, 0.0  ;;  %v2289_v28 = vld [vmem:[#allocation5 + $0x148] sm:$0xff]   ;;  %v2292_v31 = vld [vmem:[#allocation5 + $0x160] sm:$0xff]  }
 0x303   :  { %v648_v34 = vadd.f32 %v1795_v26, %v647_v33  ;;  %v707_v37 = vmax.f32 %v645_v30, 0.0  ;;  %v2291_v30 = vld [vmem:[#allocation5 + $0x158] sm:$0xff]   ;;  %v2739_v33 = vld [vmem:[#allocation7 + $0x3] ss:$0 sm:$0xff] }
 0x304   :  { %v710_v36 = vmax.f32 %v656_v32, 0.0  ;;  %v2293_v32 = vld [vmem:[#allocation5 + $0x168] sm:$0xff]  }
 0x305   :  { %v708_v38 = vmax.f32 %v648_v34, 0.0 }
 0x306   :  { %v742_v39 = vpack.c.bf16 %v710_v36, %v709_v35 }
 0x307   :  { %v741_v40 = vpack.c.bf16 %v708_v38, %v707_v37  ;;  %v2086_v41 = vpop.f32.mrb[20].mxu0 }
 0x308   :  { %v669_v42 = vadd.f32 %v2086_v41, %v1795_v26  ;;  %v660_v43 = vpop.f32.mrb[21].mxu0 }
 0x309   :  { %v661_v44 = vadd.f32 %v1795_v26, %v660_v43  ;;  %v2087_v45 = vpop.f32.mrb[22].mxu0  ;;  %2112 = vmatprep.mubr.bf16.mxu1 %v741_v40 }
 0x30a   :  { %v672_v46 = vadd.f32 %v2087_v45, %v1795_v26  ;;  %v663_v48 = vpop.f32.mrb[23].mxu0  ;;  %2113 = vmatmul.mubr.bf16.vlgmr.msra.gmra.mrb[16].mxu1 %v742_v39  ;;  %v713_v50 = vmax.f32 %v669_v42, 0.0 }
 0x30b   :  { %v664_v49 = vadd.f32 %v1795_v26, %v663_v48  ;;  %v711_v52 = vmax.f32 %v661_v44, 0.0  ;;  %2161 = vmatpush3.bf16.msra.mxu1 %v2288_v27 }
 0x30c   :  { %v714_v51 = vmax.f32 %v672_v46, 0.0  ;;  %2162 = vmatprep.subr.bf16.mxu1 %v2289_v28 }
 0x30d   :  { %v712_v53 = vmax.f32 %v664_v49, 0.0 }
 0x30e   :  { %v744_v54 = vpack.c.bf16 %v714_v51, %v713_v50 }
 0x30f   :  { %v743_v55 = vpack.c.bf16 %v712_v53, %v711_v52  ;;  %2163 = vmatpush3.bf16.msra.mxu1 %v2289_v28 }
 0x310   :  { %v2090_v56 = vpop.f32.mrb[24].mxu0  ;;  %2164 = vmatprep.subr.bf16.mxu1 %v2290_v29 }
 0x311   :  { %v685_v57 = vadd.f32 %v2090_v56, %v1795_v26  ;;  %v676_v58 = vpop.f32.mrb[25].mxu0  ;;  %2116 = vmatprep.mubr.bf16.mxu1 %v743_v55 }
 0x312   :  { %v677_v59 = vadd.f32 %v1795_v26, %v676_v58  ;;  %v2091_v60 = vpop.f32.mrb[26].mxu0  ;;  %2117 = vmatmul.mubr.bf16.gmra.mrb[20].mxu1 %v744_v54 }
 0x313   :  { %v688_v47 = vadd.f32 %v2091_v60, %v1795_v26  ;;  %v679_v61 = vpop.f32.mrb[27].mxu0  ;;  %v717_v63 = vmax.f32 %v685_v57, 0.0  ;;  %2165 = vmatpush3.bf16.msra.mxu1 %v2290_v29 }
 0x314   :  { %v680_v62 = vadd.f32 %v1795_v26, %v679_v61  ;;  %v715_v1 = vmax.f32 %v677_v59, 0.0  ;;  %2166 = vmatprep.subr.bf16.mxu1 %v2291_v30 }
 0x315   :  { %v718_v0 = vmax.f32 %v688_v47, 0.0 }
 0x316   :  { %v716_v2 = vmax.f32 %v680_v62, 0.0 }
 0x317   :  { %v746_v3 = vpack.c.bf16 %v718_v0, %v717_v63  ;;  %2167 = vmatpush3.bf16.msra.mxu1 %v2291_v30 }
 0x318   :  { %v745_v4 = vpack.c.bf16 %v716_v2, %v715_v1  ;;  %v2094_v5 = vpop.f32.mrb[28].mxu0  ;;  %2168 = vmatprep.subr.bf16.mxu1 %v2292_v31 }
 0x319   :  { %v701_v6 = vadd.f32 %v2094_v5, %v1795_v26  ;;  %v692_v7 = vpop.f32.mrb[29].mxu0 }
 0x31a   :  { %v693_v8 = vadd.f32 %v1795_v26, %v692_v7  ;;  %v2095_v9 = vpop.f32.mrb[30].mxu0  ;;  %2120 = vmatprep.mubr.bf16.mxu1 %v745_v4 }
 0x31b   :  { %v704_v10 = vadd.f32 %v2095_v9, %v1795_v26  ;;  %v695_v11 = vpop.f32.mrb[31].mxu0  ;;  %2121 = vmatmul.mubr.bf16.gmra.mrb[24].mxu1 %v746_v3  ;;  %v721_v13 = vmax.f32 %v701_v6, 0.0 }
 0x31c   :  { %v696_v12 = vadd.f32 %v1795_v26, %v695_v11  ;;  %v719_v15 = vmax.f32 %v693_v8, 0.0  ;;  %v2287_v26 = vld [vmem:[#allocation5 + $0x138] sm:$0xff]   ;;  %2169 = vmatpush3.bf16.msra.mxu1 %v2292_v31 }
 0x31d   :  { %v722_v14 = vmax.f32 %v704_v10, 0.0  ;;  %2142 = vmatprep.subr.bf16.mxu0 %v2287_v26  ;;  %2170 = vmatprep.subr.bf16.mxu1 %v2293_v32 }
 0x31e   :  { %v720_v16 = vmax.f32 %v696_v12, 0.0  ;;  %2143 = vmatpush3.bf16.msra.mxu0 %v2287_v26 }
 0x31f   :  { %v748_v17 = vpack.c.bf16 %v722_v14, %v721_v13 }
 0x320   :  { %v747_v18 = vpack.c.bf16 %v720_v16, %v719_v15  ;;  %2171 = vmatpush3.bf16.msra.mxu1 %v2293_v32 }
 0x322   :  { %2124 = vmatprep.mubr.bf16.mxu1 %v747_v18 }
 0x323   :  { %2125 = vmatmul.mubr.bf16.gmra.mrb[28].mxu1 %v748_v17 }
 0x3dd   :  { %v2114_v34 = vpop.f32.mrb[16].mxu1 }
 0x3de   :  { %v844_v35 = vadd.f32 %v2114_v34, %v2739_v33  ;;  %v835_v36 = vpop.f32.mrb[17].mxu1 }
 0x3df   :  { %v836_v37 = vadd.f32 %v2739_v33, %v835_v36  ;;  %v2115_v38 = vpop.f32.mrb[18].mxu1 }
 0x3e0   :  { %v1815_v39 = vmul.f32 -1.442695, %v844_v35  ;;  %v847_v40 = vadd.f32 %v2115_v38, %v2739_v33  ;;  %v838_v41 = vpop.f32.mrb[19].mxu1 }
 0x3e1   :  { %v1813_v42 = vmul.f32 -1.442695, %v836_v37  ;;  %v839_v43 = vadd.f32 %v2739_v33, %v838_v41 }
 0x3e2   :  { %2368 = vpow2.f32 %v1815_v39  ;;  %v1816_v44 = vmul.f32 -1.442695, %v847_v40 }
 0x3e3   :  { %2370 = vpow2.f32 %v1813_v42  ;;  %v1814_v45 = vmul.f32 -1.442695, %v839_v43 }
 0x3e4   :  { %2372 = vpow2.f32 %v1816_v44 }
 0x3e5   :  { %2374 = vpow2.f32 %v1814_v45  ;;  %v2118_v46 = vpop.f32.mrb[20].mxu1 }
 0x3e6   :  { %v860_v48 = vadd.f32 %v2118_v46, %v2739_v33  ;;  %v851_v49 = vpop.f32.mrb[21].mxu1 }
 0x3e7   :  { %v852_v50 = vadd.f32 %v2739_v33, %v851_v49  ;;  %v2119_v51 = vpop.f32.mrb[22].mxu1 }
 0x3e8   :  { %v1819_v52 = vmul.f32 -1.442695, %v860_v48  ;;  %v863_v53 = vadd.f32 %v2119_v51, %v2739_v33  ;;  %v854_v54 = vpop.f32.mrb[23].mxu1 }
 0x3e9   :  { %v1817_v55 = vmul.f32 -1.442695, %v852_v50  ;;  %v855_v56 = vadd.f32 %v2739_v33, %v854_v54 }
 0x3ea   :  { %2376 = vpow2.f32 %v1819_v52  ;;  %v1820_v57 = vmul.f32 -1.442695, %v863_v53 }
 0x3eb   :  { %2378 = vpow2.f32 %v1817_v55  ;;  %v1818_v58 = vmul.f32 -1.442695, %v855_v56 }
 0x3ec   :  { %v2369_v59 = vpop.eup %2368  ;;  %2380 = vpow2.f32 %v1820_v57 }
 0x3ed   :  { %v2371_v60 = vpop.eup %2370  ;;  %v948_v47 = vadd.f32 1.0, %v2369_v59  ;;  %2382 = vpow2.f32 %v1818_v58 }
 0x3ee   :  { %v2373_v61 = vpop.eup %2372  ;;  %v946_v62 = vadd.f32 1.0, %v2371_v60  ;;  %v2122_v63 = vpop.f32.mrb[24].mxu1 }
 0x3ef   :  { %v2375_v0 = vpop.eup %2374  ;;  %2384 = vrcp.f32 %v948_v47  ;;  %v949_v1 = vadd.f32 1.0, %v2373_v61  ;;  %v876_v2 = vadd.f32 %v2122_v63, %v2739_v33  ;;  %v867_v3 = vpop.f32.mrb[25].mxu1 }
 0x3f0   :  { %2386 = vrcp.f32 %v946_v62  ;;  %v947_v4 = vadd.f32 1.0, %v2375_v0  ;;  %v868_v5 = vadd.f32 %v2739_v33, %v867_v3  ;;  %v2123_v6 = vpop.f32.mrb[26].mxu1 }
 0x3f1   :  { %2388 = vrcp.f32 %v949_v1  ;;  %v1823_v7 = vmul.f32 -1.442695, %v876_v2  ;;  %v879_v8 = vadd.f32 %v2123_v6, %v2739_v33  ;;  %v870_v9 = vpop.f32.mrb[27].mxu1 }
 0x3f2   :  { %2390 = vrcp.f32 %v947_v4  ;;  %v1821_v10 = vmul.f32 -1.442695, %v868_v5  ;;  %v871_v11 = vadd.f32 %v2739_v33, %v870_v9 }
 0x3f3   :  { %2392 = vpow2.f32 %v1823_v7  ;;  %v1824_v12 = vmul.f32 -1.442695, %v879_v8 }
 0x3f4   :  { %v2377_v13 = vpop.eup %2376  ;;  %2394 = vpow2.f32 %v1821_v10  ;;  %v1822_v14 = vmul.f32 -1.442695, %v871_v11  ;;  %v2294_v10 = vld [vmem:[#allocation5 + $0x170] sm:$0xff]   ;;  %v2295_v11 = vld [vmem:[#allocation5 + $0x178] sm:$0xff]  }
 0x3f5   :  { %v2379_v15 = vpop.eup %2378  ;;  %v952_v16 = vadd.f32 1.0, %v2377_v13  ;;  %2396 = vpow2.f32 %v1824_v12  ;;  %2172 = vmatprep.subr.bf16.mxu1 %v2294_v10  ;;  %v1829_v12 = vld [vmem:[#allocation7 + $0x4] ss:$0 sm:$0xff] }
 0x3f6   :  { %v2381_v17 = vpop.eup %2380  ;;  %v950_v18 = vadd.f32 1.0, %v2379_v15  ;;  %2398 = vpow2.f32 %v1822_v14  ;;  %v2126_v19 = vpop.f32.mrb[28].mxu1  ;;  %2173 = vmatpush3.bf16.msra.mxu1 %v2294_v10  ;;  %v2301_v10 = vld [vmem:[#allocation5 + $0x1a8] sm:$0xff]  }
 0x3f7   :  { %v2383_v20 = vpop.eup %2382  ;;  %2400 = vrcp.f32 %v952_v16  ;;  %v953_v21 = vadd.f32 1.0, %v2381_v17  ;;  %v892_v22 = vadd.f32 %v2126_v19, %v2739_v33  ;;  %v883_v23 = vpop.f32.mrb[29].mxu1  ;;  %2174 = vmatprep.subr.bf16.mxu1 %v2295_v11 }
 0x3f8   :  { %2402 = vrcp.f32 %v950_v18  ;;  %v951_v24 = vadd.f32 1.0, %v2383_v20  ;;  %v884_v25 = vadd.f32 %v2739_v33, %v883_v23  ;;  %v2127_v26 = vpop.f32.mrb[30].mxu1 }
 0x3f9   :  { %v2385_v27 = vpop.eup %2384  ;;  %2404 = vrcp.f32 %v953_v21  ;;  %v1827_v28 = vmul.f32 -1.442695, %v892_v22  ;;  %v895_v29 = vadd.f32 %v2127_v26, %v2739_v33  ;;  %v886_v30 = vpop.f32.mrb[31].mxu1 }
 0x3fa   :  { %v2387_v31 = vpop.eup %2386  ;;  %2406 = vrcp.f32 %v951_v24  ;;  %v1825_v32 = vmul.f32 -1.442695, %v884_v25  ;;  %v887_v34 = vadd.f32 %v2739_v33, %v886_v30  ;;  %2175 = vmatpush3.bf16.msra.mxu1 %v2295_v11  ;;  %v2302_v11 = vld [vmem:[#allocation5 + $0x1b0] sm:$0xff]  }
 0x3fb   :  { %v2389_v35 = vpop.eup %2388  ;;  %2408 = vpow2.f32 %v1827_v28  ;;  %v1828_v36 = vmul.f32 -1.442695, %v895_v29 }
 0x3fc   :  { %v2391_v37 = vpop.eup %2390  ;;  %2410 = vpow2.f32 %v1825_v32  ;;  %v1826_v38 = vmul.f32 -1.442695, %v887_v34  ;;  %v1013_v39 = vpack.c.bf16 %v2389_v35, %v2385_v27 }
 0x3fd   :  { %v2393_v40 = vpop.eup %2392  ;;  %2412 = vpow2.f32 %v1828_v36  ;;  %v1012_v41 = vpack.c.bf16 %v2391_v37, %v2387_v31 }
 0x3fe   :  { %v2395_v42 = vpop.eup %2394  ;;  %v956_v43 = vadd.f32 1.0, %v2393_v40  ;;  %2414 = vpow2.f32 %v1826_v38 }
 0x3ff   :  { %v2397_v44 = vpop.eup %2396  ;;  %v954_v45 = vadd.f32 1.0, %v2395_v42  ;;  %2144 = vmatprep.mubr.bf16.mxu0 %v1012_v41 }
 0x400   :  { %v2399_v46 = vpop.eup %2398  ;;  %2416 = vrcp.f32 %v956_v43  ;;  %v957_v48 = vadd.f32 1.0, %v2397_v44  ;;  %2145 = vmatmul.mubr.bf16.vlgmr.msra.gmra.mrb[32].mxu0 %v1013_v39 }
 0x401   :  { %v2401_v33 = vpop.eup %2400  ;;  %2418 = vrcp.f32 %v954_v45  ;;  %v955_v49 = vadd.f32 1.0, %v2399_v46 }
 0x402   :  { %v2403_v50 = vpop.eup %2402  ;;  %2420 = vrcp.f32 %v957_v48 }
 0x403   :  { %v2405_v51 = vpop.eup %2404  ;;  %2422 = vrcp.f32 %v955_v49 }
 0x404   :  { %v2407_v52 = vpop.eup %2406  ;;  %v1015_v53 = vpack.c.bf16 %v2405_v51, %v2401_v33 }
 0x405   :  { %v2409_v54 = vpop.eup %2408  ;;  %v1014_v55 = vpack.c.bf16 %v2407_v52, %v2403_v50 }
 0x406   :  { %v2411_v56 = vpop.eup %2410  ;;  %v960_v57 = vadd.f32 1.0, %v2409_v54 }
 0x407   :  { %v2413_v58 = vpop.eup %2412  ;;  %v958_v59 = vadd.f32 1.0, %v2411_v56  ;;  %2148 = vmatprep.mubr.bf16.mxu0 %v1014_v55 }
 0x408   :  { %v2415_v60 = vpop.eup %2414  ;;  %2424 = vrcp.f32 %v960_v57  ;;  %v961_v47 = vadd.f32 1.0, %v2413_v58  ;;  %2149 = vmatmul.mubr.bf16.gmra.mrb[36].mxu0 %v1015_v53 }
 0x409   :  { %2426 = vrcp.f32 %v958_v59  ;;  %v959_v61 = vadd.f32 1.0, %v2415_v60 }
 0x40a   :  { %v2417_v62 = vpop.eup %2416  ;;  %2428 = vrcp.f32 %v961_v47 }
 0x40b   :  { %v2419_v63 = vpop.eup %2418  ;;  %2430 = vrcp.f32 %v959_v61 }
 0x40c   :  { %v2421_v0 = vpop.eup %2420 }
 0x40d   :  { %v2423_v1 = vpop.eup %2422  ;;  %v1017_v2 = vpack.c.bf16 %v2421_v0, %v2417_v62 }
 0x40e   :  { %v1016_v3 = vpack.c.bf16 %v2423_v1, %v2419_v63 }
 0x410   :  { %2152 = vmatprep.mubr.bf16.mxu0 %v1016_v3 }
 0x411   :  { %2153 = vmatmul.mubr.bf16.gmra.mrb[40].mxu0 %v1017_v2 }
 0x412   :  { %v2425_v4 = vpop.eup %2424 }
 0x413   :  { %v2427_v5 = vpop.eup %2426 }
 0x414   :  { %v2429_v6 = vpop.eup %2428 }
 0x415   :  { %v2431_v7 = vpop.eup %2430  ;;  %v1019_v8 = vpack.c.bf16 %v2429_v6, %v2425_v4  ;;  %v2297_v6 = vld [vmem:[#allocation5 + $0x188] sm:$0xff]  }
 0x416   :  { %v1018_v9 = vpack.c.bf16 %v2431_v7, %v2427_v5  ;;  %v2296_v5 = vld [vmem:[#allocation5 + $0x180] sm:$0xff]   ;;  %v2298_v7 = vld [vmem:[#allocation5 + $0x190] sm:$0xff]  }
 0x417   :  { %2192 = vmatprep.subr.bf16.mxu0 %v2296_v5  ;;  %2224 = vmatprep.subr.bf16.mxu1 %v2296_v5 }
 0x418   :  { %2156 = vmatprep.mubr.bf16.mxu0 %v1018_v9  ;;  %2193 = vmatpush3.bf16.msra.mxu0 %v2296_v5  ;;  %v2300_v9 = vld [vmem:[#allocation5 + $0x1a0] sm:$0xff]  }
 0x419   :  { %2157 = vmatmul.mubr.bf16.gmra.mrb[44].mxu0 %v1019_v8  ;;  %2194 = vmatprep.subr.bf16.mxu0 %v2297_v6  ;;  %v2299_v8 = vld [vmem:[#allocation5 + $0x198] sm:$0xff]  }
 0x41c   :  { %2195 = vmatpush3.bf16.msra.mxu0 %v2297_v6 }
 0x41d   :  { %2196 = vmatprep.subr.bf16.mxu0 %v2298_v7 }
 0x420   :  { %2197 = vmatpush3.bf16.msra.mxu0 %v2298_v7 }
 0x421   :  { %2198 = vmatprep.subr.bf16.mxu0 %v2299_v8 }
 0x424   :  { %2199 = vmatpush3.bf16.msra.mxu0 %v2299_v8 }
 0x425   :  { %2200 = vmatprep.subr.bf16.mxu0 %v2300_v9 }
 0x428   :  { %2201 = vmatpush3.bf16.msra.mxu0 %v2300_v9 }
 0x429   :  { %2202 = vmatprep.subr.bf16.mxu0 %v2301_v10 }
 0x42c   :  { %2203 = vmatpush3.bf16.msra.mxu0 %v2301_v10 }
 0x42d   :  { %2204 = vmatprep.subr.bf16.mxu0 %v2302_v11 }
 0x430   :  { %2205 = vmatpush3.bf16.msra.mxu0 %v2302_v11 }
 0x4d3   :  { %v2146_v13 = vpop.f32.mrb[32].mxu0 }
 0x4d4   :  { %v1115_v14 = vadd.f32 %v2146_v13, %v1829_v12  ;;  %v1106_v15 = vpop.f32.mrb[33].mxu0  ;;  %v2757_v13 = vld [vmem:[#allocation7 + $0x5] ss:$0 sm:$0xff] }
 0x4d5   :  { %v1107_v16 = vadd.f32 %v1829_v12, %v1106_v15  ;;  %v2147_v17 = vpop.f32.mrb[34].mxu0 }
 0x4d6   :  { %v1118_v18 = vadd.f32 %v2147_v17, %v1829_v12  ;;  %v1109_v19 = vpop.f32.mrb[35].mxu0  ;;  %v1171_v21 = vmax.f32 %v1115_v14, 0.0 }
 0x4d7   :  { %v1110_v20 = vadd.f32 %v1829_v12, %v1109_v19  ;;  %v1169_v23 = vmax.f32 %v1107_v16, 0.0 }
 0x4d8   :  { %v1172_v22 = vmax.f32 %v1118_v18, 0.0 }
 0x4d9   :  { %v1170_v24 = vmax.f32 %v1110_v20, 0.0 }
 0x4da   :  { %v1204_v25 = vpack.c.bf16 %v1172_v22, %v1171_v21 }
 0x4db   :  { %v1203_v26 = vpack.c.bf16 %v1170_v24, %v1169_v23  ;;  %v2150_v27 = vpop.f32.mrb[36].mxu0 }
 0x4dc   :  { %v1131_v28 = vadd.f32 %v2150_v27, %v1829_v12  ;;  %v1122_v29 = vpop.f32.mrb[37].mxu0 }
 0x4dd   :  { %v1123_v30 = vadd.f32 %v1829_v12, %v1122_v29  ;;  %v2151_v31 = vpop.f32.mrb[38].mxu0  ;;  %2176 = vmatprep.mubr.bf16.mxu1 %v1203_v26 }
 0x4de   :  { %v1134_v32 = vadd.f32 %v2151_v31, %v1829_v12  ;;  %v1125_v34 = vpop.f32.mrb[39].mxu0  ;;  %2177 = vmatmul.mubr.bf16.vlgmr.msra.gmra.mrb[32].mxu1 %v1204_v25  ;;  %v1175_v36 = vmax.f32 %v1131_v28, 0.0 }
 0x4df   :  { %v1126_v35 = vadd.f32 %v1829_v12, %v1125_v34  ;;  %v1173_v38 = vmax.f32 %v1123_v30, 0.0  ;;  %2232 = vmatpush3.bf16.msra.mxu1 %v2296_v5 }
 0x4e0   :  { %v1176_v37 = vmax.f32 %v1134_v32, 0.0  ;;  %2225 = vmatprep.subr.bf16.mxu1 %v2297_v6 }
 0x4e1   :  { %v1174_v39 = vmax.f32 %v1126_v35, 0.0 }
 0x4e2   :  { %v1206_v40 = vpack.c.bf16 %v1176_v37, %v1175_v36 }
 0x4e3   :  { %v1205_v41 = vpack.c.bf16 %v1174_v39, %v1173_v38  ;;  %2233 = vmatpush3.bf16.msra.mxu1 %v2297_v6 }
 0x4e4   :  { %v2154_v42 = vpop.f32.mrb[40].mxu0  ;;  %2226 = vmatprep.subr.bf16.mxu1 %v2298_v7 }
 0x4e5   :  { %v1147_v43 = vadd.f32 %v2154_v42, %v1829_v12  ;;  %v1138_v44 = vpop.f32.mrb[41].mxu0  ;;  %2180 = vmatprep.mubr.bf16.mxu1 %v1205_v41 }
 0x4e6   :  { %v1139_v45 = vadd.f32 %v1829_v12, %v1138_v44  ;;  %v2155_v46 = vpop.f32.mrb[42].mxu0  ;;  %2181 = vmatmul.mubr.bf16.gmra.mrb[36].mxu1 %v1206_v40 }
 0x4e7   :  { %v1150_v48 = vadd.f32 %v2155_v46, %v1829_v12  ;;  %v1141_v33 = vpop.f32.mrb[43].mxu0  ;;  %v1179_v50 = vmax.f32 %v1147_v43, 0.0  ;;  %2234 = vmatpush3.bf16.msra.mxu1 %v2298_v7 }
 0x4e8   :  { %v1142_v49 = vadd.f32 %v1829_v12, %v1141_v33  ;;  %v1177_v52 = vmax.f32 %v1139_v45, 0.0  ;;  %2227 = vmatprep.subr.bf16.mxu1 %v2299_v8 }
 0x4e9   :  { %v1180_v51 = vmax.f32 %v1150_v48, 0.0 }
 0x4ea   :  { %v1178_v53 = vmax.f32 %v1142_v49, 0.0 }
 0x4eb   :  { %v1208_v54 = vpack.c.bf16 %v1180_v51, %v1179_v50  ;;  %2235 = vmatpush3.bf16.msra.mxu1 %v2299_v8 }
 0x4ec   :  { %v1207_v55 = vpack.c.bf16 %v1178_v53, %v1177_v52  ;;  %v2158_v56 = vpop.f32.mrb[44].mxu0  ;;  %2228 = vmatprep.subr.bf16.mxu1 %v2300_v9 }
 0x4ed   :  { %v1163_v57 = vadd.f32 %v2158_v56, %v1829_v12  ;;  %v1154_v58 = vpop.f32.mrb[45].mxu0 }
 0x4ee   :  { %v1155_v59 = vadd.f32 %v1829_v12, %v1154_v58  ;;  %v2159_v60 = vpop.f32.mrb[46].mxu0  ;;  %2184 = vmatprep.mubr.bf16.mxu1 %v1207_v55 }
 0x4ef   :  { %v1166_v47 = vadd.f32 %v2159_v60, %v1829_v12  ;;  %v1157_v61 = vpop.f32.mrb[47].mxu0  ;;  %2185 = vmatmul.mubr.bf16.gmra.mrb[40].mxu1 %v1208_v54  ;;  %v1183_v63 = vmax.f32 %v1163_v57, 0.0 }
 0x4f0   :  { %v1158_v62 = vadd.f32 %v1829_v12, %v1157_v61  ;;  %v1181_v1 = vmax.f32 %v1155_v59, 0.0  ;;  %2236 = vmatpush3.bf16.msra.mxu1 %v2300_v9  ;;  %v2303_v12 = vld [vmem:[#allocation5 + $0x1b8] sm:$0xff]  }
 0x4f1   :  { %v1184_v0 = vmax.f32 %v1166_v47, 0.0  ;;  %2229 = vmatprep.subr.bf16.mxu1 %v2301_v10  ;;  %2206 = vmatprep.subr.bf16.mxu0 %v2303_v12 }
 0x4f2   :  { %v1182_v2 = vmax.f32 %v1158_v62, 0.0  ;;  %2207 = vmatpush3.bf16.msra.mxu0 %v2303_v12 }
 0x4f3   :  { %v1210_v3 = vpack.c.bf16 %v1184_v0, %v1183_v63 }
 0x4f4   :  { %v1209_v4 = vpack.c.bf16 %v1182_v2, %v1181_v1  ;;  %2237 = vmatpush3.bf16.msra.mxu1 %v2301_v10 }
 0x4f5   :  { %2230 = vmatprep.subr.bf16.mxu1 %v2302_v11 }
 0x4f6   :  { %2188 = vmatprep.mubr.bf16.mxu1 %v1209_v4 }
 0x4f7   :  { %2189 = vmatmul.mubr.bf16.gmra.mrb[44].mxu1 %v1210_v3 }
 0x4f8   :  { %2238 = vmatpush3.bf16.msra.mxu1 %v2302_v11 }
 0x4f9   :  { %2231 = vmatprep.subr.bf16.mxu1 %v2303_v12 }
 0x4fc   :  { %2239 = vmatpush3.bf16.msra.mxu1 %v2303_v12 }
 0x5b1   :  { %v2178_v14 = vpop.f32.mrb[32].mxu1 }
 0x5b2   :  { %v1306_v15 = vadd.f32 %v2178_v14, %v2757_v13  ;;  %v1297_v16 = vpop.f32.mrb[33].mxu1 }
 0x5b3   :  { %v1298_v17 = vadd.f32 %v2757_v13, %v1297_v16  ;;  %v2179_v18 = vpop.f32.mrb[34].mxu1 }
 0x5b4   :  { %v1849_v19 = vmul.f32 -1.442695, %v1306_v15  ;;  %v1309_v20 = vadd.f32 %v2179_v18, %v2757_v13  ;;  %v1300_v21 = vpop.f32.mrb[35].mxu1 }
 0x5b5   :  { %v1847_v22 = vmul.f32 -1.442695, %v1298_v17  ;;  %v1301_v23 = vadd.f32 %v2757_v13, %v1300_v21 }
 0x5b6   :  { %2432 = vpow2.f32 %v1849_v19  ;;  %v1850_v24 = vmul.f32 -1.442695, %v1309_v20 }
 0x5b7   :  { %2434 = vpow2.f32 %v1847_v22  ;;  %v1848_v25 = vmul.f32 -1.442695, %v1301_v23 }
 0x5b8   :  { %2436 = vpow2.f32 %v1850_v24 }
 0x5b9   :  { %2438 = vpow2.f32 %v1848_v25  ;;  %v2182_v26 = vpop.f32.mrb[36].mxu1 }
 0x5ba   :  { %v1322_v27 = vadd.f32 %v2182_v26, %v2757_v13  ;;  %v1313_v28 = vpop.f32.mrb[37].mxu1 }
 0x5bb   :  { %v1314_v29 = vadd.f32 %v2757_v13, %v1313_v28  ;;  %v2183_v30 = vpop.f32.mrb[38].mxu1 }
 0x5bc   :  { %v1853_v31 = vmul.f32 -1.442695, %v1322_v27  ;;  %v1325_v32 = vadd.f32 %v2183_v30, %v2757_v13  ;;  %v1316_v34 = vpop.f32.mrb[39].mxu1 }
 0x5bd   :  { %v1851_v35 = vmul.f32 -1.442695, %v1314_v29  ;;  %v1317_v36 = vadd.f32 %v2757_v13, %v1316_v34 }
 0x5be   :  { %2440 = vpow2.f32 %v1853_v31  ;;  %v1854_v37 = vmul.f32 -1.442695, %v1325_v32 }
 0x5bf   :  { %2442 = vpow2.f32 %v1851_v35  ;;  %v1852_v38 = vmul.f32 -1.442695, %v1317_v36 }
 0x5c0   :  { %v2433_v39 = vpop.eup %2432  ;;  %2444 = vpow2.f32 %v1854_v37 }
 0x5c1   :  { %v2435_v40 = vpop.eup %2434  ;;  %v1410_v41 = vadd.f32 1.0, %v2433_v39  ;;  %2446 = vpow2.f32 %v1852_v38 }
 0x5c2   :  { %v2437_v42 = vpop.eup %2436  ;;  %v1408_v43 = vadd.f32 1.0, %v2435_v40  ;;  %v2186_v44 = vpop.f32.mrb[40].mxu1 }
 0x5c3   :  { %v2439_v45 = vpop.eup %2438  ;;  %2448 = vrcp.f32 %v1410_v41  ;;  %v1411_v46 = vadd.f32 1.0, %v2437_v42  ;;  %v1338_v48 = vadd.f32 %v2186_v44, %v2757_v13  ;;  %v1329_v33 = vpop.f32.mrb[41].mxu1 }
 0x5c4   :  { %2450 = vrcp.f32 %v1408_v43  ;;  %v1409_v49 = vadd.f32 1.0, %v2439_v45  ;;  %v1330_v50 = vadd.f32 %v2757_v13, %v1329_v33  ;;  %v2187_v51 = vpop.f32.mrb[42].mxu1 }
 0x5c5   :  { %2452 = vrcp.f32 %v1411_v46  ;;  %v1857_v52 = vmul.f32 -1.442695, %v1338_v48  ;;  %v1341_v53 = vadd.f32 %v2187_v51, %v2757_v13  ;;  %v1332_v54 = vpop.f32.mrb[43].mxu1 }
 0x5c6   :  { %2454 = vrcp.f32 %v1409_v49  ;;  %v1855_v55 = vmul.f32 -1.442695, %v1330_v50  ;;  %v1333_v56 = vadd.f32 %v2757_v13, %v1332_v54 }
 0x5c7   :  { %2456 = vpow2.f32 %v1857_v52  ;;  %v1858_v57 = vmul.f32 -1.442695, %v1341_v53 }
 0x5c8   :  { %v2441_v58 = vpop.eup %2440  ;;  %2458 = vpow2.f32 %v1855_v55  ;;  %v1856_v59 = vmul.f32 -1.442695, %v1333_v56  ;;  %v2775_v55 = vld [vmem:[#allocation7 + $0x6] ss:$0 sm:$0xff] }
 0x5c9   :  { %v2443_v60 = vpop.eup %2442  ;;  %v1414_v47 = vadd.f32 1.0, %v2441_v58  ;;  %2460 = vpow2.f32 %v1858_v57 }
 0x5ca   :  { %v2445_v61 = vpop.eup %2444  ;;  %v1412_v62 = vadd.f32 1.0, %v2443_v60  ;;  %2462 = vpow2.f32 %v1856_v59  ;;  %v2190_v63 = vpop.f32.mrb[44].mxu1 }
 0x5cb   :  { %v2447_v0 = vpop.eup %2446  ;;  %2464 = vrcp.f32 %v1414_v47  ;;  %v1415_v1 = vadd.f32 1.0, %v2445_v61  ;;  %v1354_v2 = vadd.f32 %v2190_v63, %v2757_v13  ;;  %v1345_v3 = vpop.f32.mrb[45].mxu1 }
 0x5cc   :  { %2466 = vrcp.f32 %v1412_v62  ;;  %v1413_v4 = vadd.f32 1.0, %v2447_v0  ;;  %v1346_v5 = vadd.f32 %v2757_v13, %v1345_v3  ;;  %v2191_v6 = vpop.f32.mrb[46].mxu1 }
 0x5cd   :  { %v2449_v7 = vpop.eup %2448  ;;  %2468 = vrcp.f32 %v1415_v1  ;;  %v1861_v8 = vmul.f32 -1.442695, %v1354_v2  ;;  %v1357_v9 = vadd.f32 %v2191_v6, %v2757_v13  ;;  %v1348_v10 = vpop.f32.mrb[47].mxu1 }
 0x5ce   :  { %v2451_v11 = vpop.eup %2450  ;;  %2470 = vrcp.f32 %v1413_v4  ;;  %v1859_v12 = vmul.f32 -1.442695, %v1346_v5  ;;  %v1349_v14 = vadd.f32 %v2757_v13, %v1348_v10 }
 0x5cf   :  { %v2453_v15 = vpop.eup %2452  ;;  %2472 = vpow2.f32 %v1861_v8  ;;  %v1862_v16 = vmul.f32 -1.442695, %v1357_v9 }
 0x5d0   :  { %v2455_v17 = vpop.eup %2454  ;;  %2474 = vpow2.f32 %v1859_v12  ;;  %v1860_v18 = vmul.f32 -1.442695, %v1349_v14  ;;  %v1475_v19 = vpack.c.bf16 %v2453_v15, %v2449_v7 }
 0x5d1   :  { %v2457_v20 = vpop.eup %2456  ;;  %2476 = vpow2.f32 %v1862_v16  ;;  %v1474_v21 = vpack.c.bf16 %v2455_v17, %v2451_v11 }
 0x5d2   :  { %v2459_v22 = vpop.eup %2458  ;;  %v1418_v23 = vadd.f32 1.0, %v2457_v20  ;;  %2478 = vpow2.f32 %v1860_v18 }
 0x5d3   :  { %v2461_v24 = vpop.eup %2460  ;;  %v1416_v25 = vadd.f32 1.0, %v2459_v22  ;;  %2208 = vmatprep.mubr.bf16.mxu0 %v1474_v21 }
 0x5d4   :  { %v2463_v26 = vpop.eup %2462  ;;  %2480 = vrcp.f32 %v1418_v23  ;;  %v1419_v27 = vadd.f32 1.0, %v2461_v24  ;;  %2209 = vmatmul.mubr.bf16.vlgmr.msra.gmra.mrb[48].mxu0 %v1475_v19 }
 0x5d5   :  { %v2465_v13 = vpop.eup %2464  ;;  %2482 = vrcp.f32 %v1416_v25  ;;  %v1417_v28 = vadd.f32 1.0, %v2463_v26 }
 0x5d6   :  { %v2467_v29 = vpop.eup %2466  ;;  %2484 = vrcp.f32 %v1419_v27 }
 0x5d7   :  { %v2469_v30 = vpop.eup %2468  ;;  %2486 = vrcp.f32 %v1417_v28 }
 0x5d8   :  { %v2471_v31 = vpop.eup %2470  ;;  %v1477_v32 = vpack.c.bf16 %v2469_v30, %v2465_v13 }
 0x5d9   :  { %v2473_v34 = vpop.eup %2472  ;;  %v1476_v35 = vpack.c.bf16 %v2471_v31, %v2467_v29 }
 0x5da   :  { %v2475_v36 = vpop.eup %2474  ;;  %v1422_v37 = vadd.f32 1.0, %v2473_v34 }
 0x5db   :  { %v2477_v38 = vpop.eup %2476  ;;  %v1420_v39 = vadd.f32 1.0, %v2475_v36  ;;  %2212 = vmatprep.mubr.bf16.mxu0 %v1476_v35 }
 0x5dc   :  { %v2479_v40 = vpop.eup %2478  ;;  %2488 = vrcp.f32 %v1422_v37  ;;  %v1423_v41 = vadd.f32 1.0, %v2477_v38  ;;  %2213 = vmatmul.mubr.bf16.gmra.mrb[52].mxu0 %v1477_v32 }
 0x5dd   :  { %2490 = vrcp.f32 %v1420_v39  ;;  %v1421_v42 = vadd.f32 1.0, %v2479_v40 }
 0x5de   :  { %v2481_v43 = vpop.eup %2480  ;;  %2492 = vrcp.f32 %v1423_v41 }
 0x5df   :  { %v2483_v44 = vpop.eup %2482  ;;  %2494 = vrcp.f32 %v1421_v42 }
 0x5e0   :  { %v2485_v45 = vpop.eup %2484 }
 0x5e1   :  { %v2487_v46 = vpop.eup %2486  ;;  %v1479_v48 = vpack.c.bf16 %v2485_v45, %v2481_v43 }
 0x5e2   :  { %v1478_v33 = vpack.c.bf16 %v2487_v46, %v2483_v44 }
 0x5e4   :  { %2216 = vmatprep.mubr.bf16.mxu1 %v1478_v33 }
 0x5e5   :  { %2217 = vmatmul.mubr.bf16.vlgmr.msra.gmra.mrb[48].mxu1 %v1479_v48 }
 0x5e6   :  { %v2489_v49 = vpop.eup %2488 }
 0x5e7   :  { %v2491_v50 = vpop.eup %2490 }
 0x5e8   :  { %v2493_v51 = vpop.eup %2492 }
 0x5e9   :  { %v2495_v52 = vpop.eup %2494  ;;  %v1481_v53 = vpack.c.bf16 %v2493_v51, %v2489_v49 }
 0x5ea   :  { %v1480_v54 = vpack.c.bf16 %v2495_v52, %v2491_v50 }
 0x5ec   :  { %2220 = vmatprep.mubr.bf16.mxu1 %v1480_v54 }
 0x5ed   :  { %2221 = vmatmul.mubr.bf16.gmra.mrb[52].mxu1 %v1481_v53 }
 0x6a7   :  { %v2210_v56 = vpop.f32.mrb[48].mxu0 }
 0x6a8   :  { %v1577_v57 = vadd.f32 %v2210_v56, %v2775_v55  ;;  %v1568_v58 = vpop.f32.mrb[49].mxu0 }
 0x6a9   :  { %v1569_v59 = vadd.f32 %v2775_v55, %v1568_v58  ;;  %v2211_v60 = vpop.f32.mrb[50].mxu0 }
 0x6aa   :  { %v1874_v47 = vmul.f32 -1.442695, %v1577_v57  ;;  %v1580_v61 = vadd.f32 %v2211_v60, %v2775_v55  ;;  %v1571_v62 = vpop.f32.mrb[51].mxu0 }
 0x6ab   :  { %v1872_v63 = vmul.f32 -1.442695, %v1569_v59  ;;  %v1572_v0 = vadd.f32 %v2775_v55, %v1571_v62 }
 0x6ac   :  { %2496 = vpow2.f32 %v1874_v47  ;;  %v1875_v1 = vmul.f32 -1.442695, %v1580_v61 }
 0x6ad   :  { %2498 = vpow2.f32 %v1872_v63  ;;  %v1873_v2 = vmul.f32 -1.442695, %v1572_v0 }
 0x6ae   :  { %2500 = vpow2.f32 %v1875_v1 }
 0x6af   :  { %2502 = vpow2.f32 %v1873_v2  ;;  %v2214_v3 = vpop.f32.mrb[52].mxu0 }
 0x6b0   :  { %v1593_v4 = vadd.f32 %v2214_v3, %v2775_v55  ;;  %v1584_v5 = vpop.f32.mrb[53].mxu0 }
 0x6b1   :  { %v1585_v6 = vadd.f32 %v2775_v55, %v1584_v5  ;;  %v2215_v7 = vpop.f32.mrb[54].mxu0 }
 0x6b2   :  { %v1878_v8 = vmul.f32 -1.442695, %v1593_v4  ;;  %v1596_v9 = vadd.f32 %v2215_v7, %v2775_v55  ;;  %v1587_v10 = vpop.f32.mrb[55].mxu0 }
 0x6b3   :  { %v1876_v11 = vmul.f32 -1.442695, %v1585_v6  ;;  %v1588_v12 = vadd.f32 %v2775_v55, %v1587_v10 }
 0x6b4   :  { %2504 = vpow2.f32 %v1878_v8  ;;  %v1879_v14 = vmul.f32 -1.442695, %v1596_v9 }
 0x6b5   :  { %2506 = vpow2.f32 %v1876_v11  ;;  %v1877_v15 = vmul.f32 -1.442695, %v1588_v12 }
 0x6b6   :  { %v2497_v16 = vpop.eup %2496  ;;  %2508 = vpow2.f32 %v1879_v14 }
 0x6b7   :  { %v2499_v17 = vpop.eup %2498  ;;  %v1681_v18 = vadd.f32 1.0, %v2497_v16  ;;  %2510 = vpow2.f32 %v1877_v15 }
 0x6b8   :  { %v2501_v19 = vpop.eup %2500  ;;  %v1679_v20 = vadd.f32 1.0, %v2499_v17  ;;  %v2218_v21 = vpop.f32.mrb[48].mxu1 }
 0x6b9   :  { %v2503_v22 = vpop.eup %2502  ;;  %2512 = vrcp.f32 %v1681_v18  ;;  %v1682_v23 = vadd.f32 1.0, %v2501_v19  ;;  %v1609_v24 = vadd.f32 %v2218_v21, %v2775_v55  ;;  %v1600_v25 = vpop.f32.mrb[49].mxu1 }
 0x6ba   :  { %2514 = vrcp.f32 %v1679_v20  ;;  %v1680_v26 = vadd.f32 1.0, %v2503_v22  ;;  %v1601_v27 = vadd.f32 %v2775_v55, %v1600_v25  ;;  %v2219_v13 = vpop.f32.mrb[50].mxu1 }
 0x6bb   :  { %2516 = vrcp.f32 %v1682_v23  ;;  %v1882_v28 = vmul.f32 -1.442695, %v1609_v24  ;;  %v1612_v29 = vadd.f32 %v2219_v13, %v2775_v55  ;;  %v1603_v30 = vpop.f32.mrb[51].mxu1 }
 0x6bc   :  { %2518 = vrcp.f32 %v1680_v26  ;;  %v1880_v31 = vmul.f32 -1.442695, %v1601_v27  ;;  %v1604_v32 = vadd.f32 %v2775_v55, %v1603_v30 }
 0x6bd   :  { %2520 = vpow2.f32 %v1882_v28  ;;  %v1883_v34 = vmul.f32 -1.442695, %v1612_v29 }
 0x6be   :  { %v2505_v35 = vpop.eup %2504  ;;  %2522 = vpow2.f32 %v1880_v31  ;;  %v1881_v36 = vmul.f32 -1.442695, %v1604_v32 }
 0x6bf   :  { %v2507_v37 = vpop.eup %2506  ;;  %v1685_v38 = vadd.f32 1.0, %v2505_v35  ;;  %2524 = vpow2.f32 %v1883_v34 }
 0x6c0   :  { %v2509_v39 = vpop.eup %2508  ;;  %v1683_v40 = vadd.f32 1.0, %v2507_v37  ;;  %2526 = vpow2.f32 %v1881_v36  ;;  %v2222_v41 = vpop.f32.mrb[52].mxu1 }
 0x6c1   :  { %v2511_v42 = vpop.eup %2510  ;;  %2528 = vrcp.f32 %v1685_v38  ;;  %v1686_v43 = vadd.f32 1.0, %v2509_v39  ;;  %v1625_v44 = vadd.f32 %v2222_v41, %v2775_v55  ;;  %v1616_v45 = vpop.f32.mrb[53].mxu1 }
 0x6c2   :  { %2530 = vrcp.f32 %v1683_v40  ;;  %v1684_v46 = vadd.f32 1.0, %v2511_v42  ;;  %v1617_v48 = vadd.f32 %v2775_v55, %v1616_v45  ;;  %v2223_v33 = vpop.f32.mrb[54].mxu1 }
 0x6c3   :  { %v2513_v49 = vpop.eup %2512  ;;  %2532 = vrcp.f32 %v1686_v43  ;;  %v1886_v50 = vmul.f32 -1.442695, %v1625_v44  ;;  %v1628_v51 = vadd.f32 %v2223_v33, %v2775_v55  ;;  %v1619_v52 = vpop.f32.mrb[55].mxu1 }
 0x6c4   :  { %v2515_v53 = vpop.eup %2514  ;;  %1729 = vst [vmem:[#allocation8 + $0x10] sm:$0xff] %v2513_v49  ;;  %2534 = vrcp.f32 %v1684_v46  ;;  %v1884_v54 = vmul.f32 -1.442695, %v1617_v48  ;;  %v1620_v56 = vadd.f32 %v2775_v55, %v1619_v52 }
 0x6c5   :  { %v2517_v57 = vpop.eup %2516  ;;  %1727 = vst [vmem:[#allocation8] sm:$0xff] %v2515_v53  ;;  %2536 = vpow2.f32 %v1886_v50  ;;  %v1887_v58 = vmul.f32 -1.442695, %v1628_v51 }
 0x6c6   :  { %v2519_v59 = vpop.eup %2518  ;;  %1730 = vst [vmem:[#allocation8 + $0x18] sm:$0xff] %v2517_v57  ;;  %2538 = vpow2.f32 %v1884_v54  ;;  %v1885_v60 = vmul.f32 -1.442695, %v1620_v56 }
 0x6c7   :  { %v2521_v47 = vpop.eup %2520  ;;  %1728 = vst [vmem:[#allocation8 + $0x8] sm:$0xff] %v2519_v59  ;;  %2540 = vpow2.f32 %v1887_v58 }
 0x6c8   :  { %v2523_v61 = vpop.eup %2522  ;;  %v1689_v62 = vadd.f32 1.0, %v2521_v47  ;;  %2542 = vpow2.f32 %v1885_v60 }
 0x6c9   :  { %v2525_v63 = vpop.eup %2524  ;;  %v1687_v0 = vadd.f32 1.0, %v2523_v61 }
 0x6ca   :  { %v2527_v1 = vpop.eup %2526  ;;  %2544 = vrcp.f32 %v1689_v62  ;;  %v1690_v2 = vadd.f32 1.0, %v2525_v63 }
 0x6cb   :  { %v2529_v55 = vpop.eup %2528  ;;  %2546 = vrcp.f32 %v1687_v0  ;;  %v1688_v3 = vadd.f32 1.0, %v2527_v1 }
 0x6cc   :  { %v2531_v4 = vpop.eup %2530  ;;  %1733 = vst [vmem:[#allocation8 + $0x30] sm:$0xff] %v2529_v55  ;;  %2548 = vrcp.f32 %v1690_v2 }
 0x6cd   :  { %v2533_v5 = vpop.eup %2532  ;;  %1731 = vst [vmem:[#allocation8 + $0x20] sm:$0xff] %v2531_v4  ;;  %2550 = vrcp.f32 %v1688_v3 }
 0x6ce   :  { %v2535_v6 = vpop.eup %2534  ;;  %1734 = vst [vmem:[#allocation8 + $0x38] sm:$0xff] %v2533_v5 }
 0x6cf   :  { %v2537_v7 = vpop.eup %2536  ;;  %1732 = vst [vmem:[#allocation8 + $0x28] sm:$0xff] %v2535_v6 }
 0x6d0   :  { %v2539_v8 = vpop.eup %2538  ;;  %v1693_v9 = vadd.f32 1.0, %v2537_v7 }
 0x6d1   :  { %v2541_v10 = vpop.eup %2540  ;;  %v1691_v11 = vadd.f32 1.0, %v2539_v8 }
 0x6d2   :  { %v2543_v12 = vpop.eup %2542  ;;  %2552 = vrcp.f32 %v1693_v9  ;;  %v1694_v14 = vadd.f32 1.0, %v2541_v10 }
 0x6d3   :  { %2554 = vrcp.f32 %v1691_v11  ;;  %v1692_v15 = vadd.f32 1.0, %v2543_v12 }
 0x6d4   :  { %v2545_v16 = vpop.eup %2544  ;;  %2556 = vrcp.f32 %v1694_v14 }
 0x6d5   :  { %v2547_v17 = vpop.eup %2546  ;;  %1737 = vst [vmem:[#allocation8 + $0x50] sm:$0xff] %v2545_v16  ;;  %2558 = vrcp.f32 %v1692_v15 }
 0x6d6   :  { %v2549_v18 = vpop.eup %2548  ;;  %1735 = vst [vmem:[#allocation8 + $0x40] sm:$0xff] %v2547_v17 }
 0x6d7   :  { %v2551_v19 = vpop.eup %2550  ;;  %1738 = vst [vmem:[#allocation8 + $0x58] sm:$0xff] %v2549_v18 }
 0x6d8   :  { %1736 = vst [vmem:[#allocation8 + $0x48] sm:$0xff] %v2551_v19 }
 0x6dc   :  { %v2553_v20 = vpop.eup %2552 }
 0x6dd   :  { %v2555_v21 = vpop.eup %2554  ;;  %1741 = vst [vmem:[#allocation8 + $0x70] sm:$0xff] %v2553_v20 }
 0x6de   :  { %v2557_v22 = vpop.eup %2556  ;;  %1739 = vst [vmem:[#allocation8 + $0x60] sm:$0xff] %v2555_v21 }
 0x6df   :  { %v2559_v23 = vpop.eup %2558  ;;  %1742 = vst [vmem:[#allocation8 + $0x78] sm:$0xff] %v2557_v22 }
 0x6e0   :  { %1740 = vst [vmem:[#allocation8 + $0x68] sm:$0xff] %v2559_v23 }
 0x6e1   :  { %2637 = shalt.err (!%p2634_p0)
}
 0x6e2   :  { %s2638_s27 = scalar_lea.hbm %s2811_s3, 2048 }
 0x6e3   :  { %p2639_p1 = scmp.ne.s32.totalorder %s2811_s3, %s2638_s27  ;;  %p2642_p2 = scmp.lt.u32.totalorder %s2638_s27, %s2811_s3 }
 0x6e5   :  { %p2644_p3 = pnand %p2642_p2, %p2639_p1 }
 0x6e7   :  { %2647 = shalt.err (!%p2644_p3)
}
 0x6e8   :  { %1754 = dma.vmem_to_hbm [thread:$0]  %s1749_s23, 2048, %s2811_s3, [#allocation4], %s2658_s1, %s2658_s1, %s2659_s9  }
 0x6e9   :  { %2652 = dma.done.wait [#allocation4], 2048  }
 0x6ea   :  { %2653 = vsyncadd [#allocation4], 4294965248 }
 0x6eb   :  { %1758 = vsyncpa [#allocation3], 1 }
 0x6ec   :  { %1759 = vsyncpa [#allocation6], 1 }
 0x6ed   :  { %1760 = vsyncpa [#allocation4], 1 }

</bundles_post_ra>
